<compile_context>
chip_gen: v5e
topology: v5e:2x2
jax: 0.10.0
libtpu: 0.0.40
codegen_flags: <defaults>
</compile_context>

<pallas_src>
import functools

import jax
import jax.numpy as jnp
from jax import lax
from jax.experimental import pallas as pl
from jax.experimental.pallas import tpu as pltpu


def _resblock_kernel(x_ref, edge_ref, w1_ref, w2_ref, b1_ref, b2_ref,
                     o_ref, *, width):
    """One image per grid step, spatial dims flattened onto the lane axis.

    x_ref   : (1, C, H*W)  input image (f32), NC(HW) layout
    edge_ref: (2, H*W)     column-validity masks (row 0: x>=1, row 1: x<=W-2)
    w*_ref  : (C, 9*C)     conv weights with BN scale pre-folded,
                           w[co, (3*ky+kx)*C + ci]
    b*_ref  : (C, 1)       folded BN bias (beta - mean*scale)
    o_ref   : (1, C, H*W)  output
    """
    _, C, HW = o_ref.shape
    x = x_ref[0]                         # (C, HW) f32: conv1 input + residual

    # Hoisted once: left/right column validity masks, shape (1, HW).
    mask_l = edge_ref[0:1, :]
    mask_r = edge_ref[1:2, :]

    def shift_tap(a, oy, ox):
        """out[:, p] = a[:, p + oy*W + ox] if (y+oy, x+ox) in-bounds else 0."""
        off = oy * width + ox
        if off > 0:
            s = jnp.concatenate(
                [a[:, off:], jnp.zeros((C, off), a.dtype)], axis=1)
        elif off < 0:
            s = jnp.concatenate(
                [jnp.zeros((C, -off), a.dtype), a[:, :off]], axis=1)
        else:
            s = a
        # Row (y) out-of-bounds is fully covered by the zero fill above; only
        # the column (x) wrap across row boundaries needs masking.
        if ox == -1:
            s = s * mask_l
        elif ox == 1:
            s = s * mask_r
        return s

    def conv3x3(a, w_ref, acc0):
        acc = acc0
        for ky in range(3):
            for kx in range(3):
                s = shift_tap(a, ky - 1, kx - 1)               # (C_in, HW)
                base = (3 * ky + kx) * C
                for ci in range(C):
                    wcol = w_ref[:, base + ci:base + ci + 1]   # (C_out, 1)
                    term = wcol * s[ci:ci + 1, :]              # (C_out, HW)
                    acc = term if acc is None else acc + term
        return acc

    # conv1 (BN scale folded into w1) -> +bias1 -> relu   (all f32 VPU math)
    act1 = jnp.maximum(conv3x3(x, w1_ref, None) + b1_ref[...], 0.0)
    # conv2 (BN scale folded into w2); accumulator starts at identity + bias2,
    # so the epilogue is just the ReLU.
    out = jnp.maximum(conv3x3(act1, w2_ref, x + b2_ref[...]), 0.0)
    o_ref[0] = out.astype(o_ref.dtype)


@functools.partial(jax.jit, static_argnames=("eps",))
def resblock_pallas(x_nchw, params, eps=1e-5):
    N, C, H, W = x_nchw.shape
    HW = H * W
    # NCHW -> (N, C, H*W): a pure reshape of contiguous data — no transpose,
    # and no host-side padding copy (halo handled inside the kernel).
    x = x_nchw.astype(jnp.float32).reshape(N, C, HW)

    def fold_bn(gamma, beta, mean, var):
        scale = (gamma / jnp.sqrt(var + eps)).astype(jnp.float32)
        bias = (beta.astype(jnp.float32)
                - mean.astype(jnp.float32) * scale)
        return scale, bias

    def pack_w(w_oihw, scale):
        # Fold BN scale into the conv weights (per output channel), then
        # (Cout, Cin, 3, 3) -> (Cout, 9*Cin) with w[co, (3*ky+kx)*C + ci].
        w = w_oihw.astype(jnp.float32) * scale.reshape(C, 1, 1, 1)
        return jnp.transpose(w, (0, 2, 3, 1)).reshape(C, 9 * C)

    s1, b1 = fold_bn(params["bn1_gamma"], params["bn1_beta"],
                     params["bn1_mean"], params["bn1_var"])
    s2, b2 = fold_bn(params["bn2_gamma"], params["bn2_beta"],
                     params["bn2_mean"], params["bn2_var"])
    w1 = pack_w(params["conv1_w"], s1)
    w2 = pack_w(params["conv2_w"], s2)
    b1 = b1.reshape(C, 1)
    b2 = b2.reshape(C, 1)

    # Column-validity masks (2*HW floats, built once outside the kernel).
    xi = jnp.arange(HW, dtype=jnp.int32) % W
    edge = jnp.stack([(xi >= 1), (xi <= W - 2)]).astype(jnp.float32)  # (2, HW)

    const = lambda n: (0, 0)   # weights / biases / masks: constant index maps
    # NOTE: for large C, set pipeline_mode=pl.Buffered(1) on these constant
    # inputs (or DMA them once into persistent scratch); at C=4 the
    # double-buffered copies total <3 KiB so it is not worth it.
    out_flat = pl.pallas_call(
        functools.partial(_resblock_kernel, width=W),
        out_shape=jax.ShapeDtypeStruct((N, C, HW), jnp.float32),
        grid_spec=pltpu.PrefetchScalarGridSpec(
            num_scalar_prefetch=0,
            grid=(N,),
            in_specs=[
                pl.BlockSpec((1, C, HW), lambda n: (n, 0, 0)),
                pl.BlockSpec((2, HW), const),
                pl.BlockSpec((C, 9 * C), const),
                pl.BlockSpec((C, 9 * C), const),
                pl.BlockSpec((C, 1), const),
                pl.BlockSpec((C, 1), const),
            ],
            out_specs=pl.BlockSpec((1, C, HW), lambda n: (n, 0, 0)),
        ),
        compiler_params=pltpu.CompilerParams(
            dimension_semantics=("parallel",)),
    )(x, edge, w1, w2, b1, b2)

    return out_flat.reshape(N, C, H, W)


def resblock_reference(x_nchw, params, eps=1e-5):
    """Pure-JAX reference (matches PyTorch eval-mode ResBlock forward)."""
    x = x_nchw.astype(jnp.float32)
    dn = ("NCHW", "OIHW", "NCHW")

    def conv(inp, w):
        return lax.conv_general_dilated(inp, w.astype(jnp.float32), (1, 1),
                                        "SAME", dimension_numbers=dn)

    def bn(inp, g, b, m, v):
        g, b, m, v = (t.reshape(1, -1, 1, 1) for t in (g, b, m, v))
        return (inp - m) / jnp.sqrt(v + eps) * g + b

    out = conv(x, params["conv1_w"])
    out = bn(out, params["bn1_gamma"], params["bn1_beta"],
             params["bn1_mean"], params["bn1_var"])
    out = jnp.maximum(out, 0.0)
    out = conv(out, params["conv2_w"])
    out = bn(out, params["bn2_gamma"], params["bn2_beta"],
             params["bn2_mean"], params["bn2_var"])
    return jnp.maximum(out + x, 0.0)


def make_params(key, C):
    ks = jax.random.split(key, 8)
    return {
        "conv1_w": jax.random.normal(ks[0], (C, C, 3, 3), jnp.float32) * 0.1,
        "conv2_w": jax.random.normal(ks[1], (C, C, 3, 3), jnp.float32) * 0.1,
        "bn1_gamma": 1.0 + 0.1 * jax.random.normal(ks[2], (C,), jnp.float32),
        "bn1_beta": 0.1 * jax.random.normal(ks[3], (C,), jnp.float32),
        "bn1_mean": 0.1 * jax.random.normal(ks[4], (C,), jnp.float32),
        "bn1_var": jax.random.uniform(ks[5], (C,), jnp.float32, 0.5, 1.5),
        "bn2_gamma": 1.0 + 0.1 * jax.random.normal(ks[6], (C,), jnp.float32),
        "bn2_beta": 0.1 * jax.random.normal(ks[7], (C,), jnp.float32),
        "bn2_mean": jnp.zeros((C,), jnp.float32),
        "bn2_var": jnp.ones((C,), jnp.float32),
    }


if __name__ == "__main__":
    key = jax.random.PRNGKey(0)
    k_x, k_p = jax.random.split(key)

    N, C, H, W = 2, 4, 16, 16          # NCHW, as in PyTorch
    x = jax.random.normal(k_x, (N, C, H, W), jnp.float32)
    params = make_params(k_p, C)

    out = jax.block_until_ready(resblock_pallas(x, params))
    ref = resblock_reference(x, params)

    assert out.shape == (N, C, H, W)
    max_err = float(jnp.max(jnp.abs(out - ref)))
    assert jnp.allclose(out, ref, rtol=1e-4, atol=1e-4), (
        f"max abs err {max_err}")

    print("KERNEL_OK")
</pallas_src>

<mosaic_0001>
module attributes {stable_mosaic.version = 11 : i64} {
  func.func @_resblock_kernel(%arg0: i32, %arg1: memref<1x4x256xf32, #tpu.memory_space<vmem>>, %arg2: memref<2x256xf32, #tpu.memory_space<vmem>>, %arg3: memref<4x36xf32, #tpu.memory_space<vmem>>, %arg4: memref<4x36xf32, #tpu.memory_space<vmem>>, %arg5: memref<4x1xf32, #tpu.memory_space<vmem>>, %arg6: memref<4x1xf32, #tpu.memory_space<vmem>>, %arg7: memref<1x4x256xf32, #tpu.memory_space<vmem>>) attributes {dimension_semantics = [#tpu.dimension_semantics<parallel>], iteration_bounds = array<i64: 2>, scalar_prefetch = 0 : i64, scratch_operands = 0 : i64, tpu.core_type = #tpu.core_type<tc>, window_params = [{transform_indices = @transform_0, window_bounds = array<i64: 1, 4, 256>}, {pipeline_mode = #tpu.pipeline_mode<synchronous>, transform_indices = @transform_1, window_bounds = array<i64: 2, 256>}, {pipeline_mode = #tpu.pipeline_mode<synchronous>, transform_indices = @transform_2, window_bounds = array<i64: 4, 36>}, {pipeline_mode = #tpu.pipeline_mode<synchronous>, transform_indices = @transform_3, window_bounds = array<i64: 4, 36>}, {pipeline_mode = #tpu.pipeline_mode<synchronous>, transform_indices = @transform_4, window_bounds = array<i64: 4, 1>}, {pipeline_mode = #tpu.pipeline_mode<synchronous>, transform_indices = @transform_5, window_bounds = array<i64: 4, 1>}, {transform_indices = @transform_6, window_bounds = array<i64: 1, 4, 256>}]} {
    %c0 = arith.constant 0 : index
    %c0_0 = arith.constant 0 : index
    %c0_1 = arith.constant 0 : index
    %0 = vector.load %arg1[%c0, %c0_0, %c0_1] : memref<1x4x256xf32, #tpu.memory_space<vmem>>, vector<1x4x256xf32>
    %1 = vector.shape_cast %0 : vector<1x4x256xf32> to vector<4x256xf32>
    %c0_2 = arith.constant 0 : index
    %c0_3 = arith.constant 0 : index
    %2 = vector.load %arg2[%c0_2, %c0_3] : memref<2x256xf32, #tpu.memory_space<vmem>>, vector<1x256xf32>
    %c1 = arith.constant 1 : index
    %c0_4 = arith.constant 0 : index
    %3 = vector.load %arg2[%c1, %c0_4] : memref<2x256xf32, #tpu.memory_space<vmem>>, vector<1x256xf32>
    %cst = arith.constant 0.000000e+00 : f32
    %4 = vector.broadcast %cst : f32 to vector<4x17xf32>
    %5 = vector.extract_strided_slice %1 {offsets = [0, 0], sizes = [4, 239], strides = [1, 1]} : vector<4x256xf32> to vector<4x239xf32>
    %6 = tpu.concatenate %4, %5 in 1 : vector<4x17xf32>, vector<4x239xf32> -> vector<4x256xf32>
    %7 = vector.broadcast %2 : vector<1x256xf32> to vector<4x256xf32>
    %8 = arith.mulf %6, %7 : vector<4x256xf32>
    %c0_5 = arith.constant 0 : index
    %c0_6 = arith.constant 0 : index
    %9 = vector.load %arg3[%c0_5, %c0_6] : memref<4x36xf32, #tpu.memory_space<vmem>>, vector<4x1xf32>
    %10 = vector.extract_strided_slice %8 {offsets = [0, 0], sizes = [1, 256], strides = [1, 1]} : vector<4x256xf32> to vector<1x256xf32>
    %11 = vector.broadcast %9 : vector<4x1xf32> to vector<4x256xf32>
    %12 = vector.broadcast %10 : vector<1x256xf32> to vector<4x256xf32>
    %13 = arith.mulf %11, %12 : vector<4x256xf32>
    %c0_7 = arith.constant 0 : index
    %c1_8 = arith.constant 1 : index
    %14 = vector.load %arg3[%c0_7, %c1_8] : memref<4x36xf32, #tpu.memory_space<vmem>>, vector<4x1xf32>
    %15 = vector.extract_strided_slice %8 {offsets = [1, 0], sizes = [1, 256], strides = [1, 1]} : vector<4x256xf32> to vector<1x256xf32>
    %16 = vector.broadcast %14 : vector<4x1xf32> to vector<4x256xf32>
    %17 = vector.broadcast %15 : vector<1x256xf32> to vector<4x256xf32>
    %18 = arith.mulf %16, %17 : vector<4x256xf32>
    %19 = arith.addf %13, %18 : vector<4x256xf32>
    %c0_9 = arith.constant 0 : index
    %c2 = arith.constant 2 : index
    %20 = vector.load %arg3[%c0_9, %c2] : memref<4x36xf32, #tpu.memory_space<vmem>>, vector<4x1xf32>
    %21 = vector.extract_strided_slice %8 {offsets = [2, 0], sizes = [1, 256], strides = [1, 1]} : vector<4x256xf32> to vector<1x256xf32>
    %22 = vector.broadcast %20 : vector<4x1xf32> to vector<4x256xf32>
    %23 = vector.broadcast %21 : vector<1x256xf32> to vector<4x256xf32>
    %24 = arith.mulf %22, %23 : vector<4x256xf32>
    %25 = arith.addf %19, %24 : vector<4x256xf32>
    %c0_10 = arith.constant 0 : index
    %c3 = arith.constant 3 : index
    %26 = vector.load %arg3[%c0_10, %c3] : memref<4x36xf32, #tpu.memory_space<vmem>>, vector<4x1xf32>
    %27 = vector.extract_strided_slice %8 {offsets = [3, 0], sizes = [1, 256], strides = [1, 1]} : vector<4x256xf32> to vector<1x256xf32>
    %28 = vector.broadcast %26 : vector<4x1xf32> to vector<4x256xf32>
    %29 = vector.broadcast %27 : vector<1x256xf32> to vector<4x256xf32>
    %30 = arith.mulf %28, %29 : vector<4x256xf32>
    %31 = arith.addf %25, %30 : vector<4x256xf32>
    %cst_11 = arith.constant 0.000000e+00 : f32
    %32 = vector.broadcast %cst_11 : f32 to vector<4x16xf32>
    %33 = vector.extract_strided_slice %1 {offsets = [0, 0], sizes = [4, 240], strides = [1, 1]} : vector<4x256xf32> to vector<4x240xf32>
    %34 = tpu.concatenate %32, %33 in 1 : vector<4x16xf32>, vector<4x240xf32> -> vector<4x256xf32>
    %c0_12 = arith.constant 0 : index
    %c4 = arith.constant 4 : index
    %35 = vector.load %arg3[%c0_12, %c4] : memref<4x36xf32, #tpu.memory_space<vmem>>, vector<4x1xf32>
    %36 = vector.extract_strided_slice %34 {offsets = [0, 0], sizes = [1, 256], strides = [1, 1]} : vector<4x256xf32> to vector<1x256xf32>
    %37 = vector.broadcast %35 : vector<4x1xf32> to vector<4x256xf32>
    %38 = vector.broadcast %36 : vector<1x256xf32> to vector<4x256xf32>
    %39 = arith.mulf %37, %38 : vector<4x256xf32>
    %40 = arith.addf %31, %39 : vector<4x256xf32>
    %c0_13 = arith.constant 0 : index
    %c5 = arith.constant 5 : index
    %41 = vector.load %arg3[%c0_13, %c5] : memref<4x36xf32, #tpu.memory_space<vmem>>, vector<4x1xf32>
    %42 = vector.extract_strided_slice %34 {offsets = [1, 0], sizes = [1, 256], strides = [1, 1]} : vector<4x256xf32> to vector<1x256xf32>
    %43 = vector.broadcast %41 : vector<4x1xf32> to vector<4x256xf32>
    %44 = vector.broadcast %42 : vector<1x256xf32> to vector<4x256xf32>
    %45 = arith.mulf %43, %44 : vector<4x256xf32>
    %46 = arith.addf %40, %45 : vector<4x256xf32>
    %c0_14 = arith.constant 0 : index
    %c6 = arith.constant 6 : index
    %47 = vector.load %arg3[%c0_14, %c6] : memref<4x36xf32, #tpu.memory_space<vmem>>, vector<4x1xf32>
    %48 = vector.extract_strided_slice %34 {offsets = [2, 0], sizes = [1, 256], strides = [1, 1]} : vector<4x256xf32> to vector<1x256xf32>
    %49 = vector.broadcast %47 : vector<4x1xf32> to vector<4x256xf32>
    %50 = vector.broadcast %48 : vector<1x256xf32> to vector<4x256xf32>
    %51 = arith.mulf %49, %50 : vector<4x256xf32>
    %52 = arith.addf %46, %51 : vector<4x256xf32>
    %c0_15 = arith.constant 0 : index
    %c7 = arith.constant 7 : index
    %53 = vector.load %arg3[%c0_15, %c7] : memref<4x36xf32, #tpu.memory_space<vmem>>, vector<4x1xf32>
    %54 = vector.extract_strided_slice %34 {offsets = [3, 0], sizes = [1, 256], strides = [1, 1]} : vector<4x256xf32> to vector<1x256xf32>
    %55 = vector.broadcast %53 : vector<4x1xf32> to vector<4x256xf32>
    %56 = vector.broadcast %54 : vector<1x256xf32> to vector<4x256xf32>
    %57 = arith.mulf %55, %56 : vector<4x256xf32>
    %58 = arith.addf %52, %57 : vector<4x256xf32>
    %cst_16 = arith.constant 0.000000e+00 : f32
    %59 = vector.broadcast %cst_16 : f32 to vector<4x15xf32>
    %60 = vector.extract_strided_slice %1 {offsets = [0, 0], sizes = [4, 241], strides = [1, 1]} : vector<4x256xf32> to vector<4x241xf32>
    %61 = tpu.concatenate %59, %60 in 1 : vector<4x15xf32>, vector<4x241xf32> -> vector<4x256xf32>
    %62 = vector.broadcast %3 : vector<1x256xf32> to vector<4x256xf32>
    %63 = arith.mulf %61, %62 : vector<4x256xf32>
    %c0_17 = arith.constant 0 : index
    %c8 = arith.constant 8 : index
    %64 = vector.load %arg3[%c0_17, %c8] : memref<4x36xf32, #tpu.memory_space<vmem>>, vector<4x1xf32>
    %65 = vector.extract_strided_slice %63 {offsets = [0, 0], sizes = [1, 256], strides = [1, 1]} : vector<4x256xf32> to vector<1x256xf32>
    %66 = vector.broadcast %64 : vector<4x1xf32> to vector<4x256xf32>
    %67 = vector.broadcast %65 : vector<1x256xf32> to vector<4x256xf32>
    %68 = arith.mulf %66, %67 : vector<4x256xf32>
    %69 = arith.addf %58, %68 : vector<4x256xf32>
    %c0_18 = arith.constant 0 : index
    %c9 = arith.constant 9 : index
    %70 = vector.load %arg3[%c0_18, %c9] : memref<4x36xf32, #tpu.memory_space<vmem>>, vector<4x1xf32>
    %71 = vector.extract_strided_slice %63 {offsets = [1, 0], sizes = [1, 256], strides = [1, 1]} : vector<4x256xf32> to vector<1x256xf32>
    %72 = vector.broadcast %70 : vector<4x1xf32> to vector<4x256xf32>
    %73 = vector.broadcast %71 : vector<1x256xf32> to vector<4x256xf32>
    %74 = arith.mulf %72, %73 : vector<4x256xf32>
    %75 = arith.addf %69, %74 : vector<4x256xf32>
    %c0_19 = arith.constant 0 : index
    %c10 = arith.constant 10 : index
    %76 = vector.load %arg3[%c0_19, %c10] : memref<4x36xf32, #tpu.memory_space<vmem>>, vector<4x1xf32>
    %77 = vector.extract_strided_slice %63 {offsets = [2, 0], sizes = [1, 256], strides = [1, 1]} : vector<4x256xf32> to vector<1x256xf32>
    %78 = vector.broadcast %76 : vector<4x1xf32> to vector<4x256xf32>
    %79 = vector.broadcast %77 : vector<1x256xf32> to vector<4x256xf32>
    %80 = arith.mulf %78, %79 : vector<4x256xf32>
    %81 = arith.addf %75, %80 : vector<4x256xf32>
    %c0_20 = arith.constant 0 : index
    %c11 = arith.constant 11 : index
    %82 = vector.load %arg3[%c0_20, %c11] : memref<4x36xf32, #tpu.memory_space<vmem>>, vector<4x1xf32>
    %83 = vector.extract_strided_slice %63 {offsets = [3, 0], sizes = [1, 256], strides = [1, 1]} : vector<4x256xf32> to vector<1x256xf32>
    %84 = vector.broadcast %82 : vector<4x1xf32> to vector<4x256xf32>
    %85 = vector.broadcast %83 : vector<1x256xf32> to vector<4x256xf32>
    %86 = arith.mulf %84, %85 : vector<4x256xf32>
    %87 = arith.addf %81, %86 : vector<4x256xf32>
    %cst_21 = arith.constant 0.000000e+00 : f32
    %88 = vector.broadcast %cst_21 : f32 to vector<4x1xf32>
    %89 = vector.extract_strided_slice %1 {offsets = [0, 0], sizes = [4, 255], strides = [1, 1]} : vector<4x256xf32> to vector<4x255xf32>
    %90 = tpu.concatenate %88, %89 in 1 : vector<4x1xf32>, vector<4x255xf32> -> vector<4x256xf32>
    %91 = vector.broadcast %2 : vector<1x256xf32> to vector<4x256xf32>
    %92 = arith.mulf %90, %91 : vector<4x256xf32>
    %c0_22 = arith.constant 0 : index
    %c12 = arith.constant 12 : index
    %93 = vector.load %arg3[%c0_22, %c12] : memref<4x36xf32, #tpu.memory_space<vmem>>, vector<4x1xf32>
    %94 = vector.extract_strided_slice %92 {offsets = [0, 0], sizes = [1, 256], strides = [1, 1]} : vector<4x256xf32> to vector<1x256xf32>
    %95 = vector.broadcast %93 : vector<4x1xf32> to vector<4x256xf32>
    %96 = vector.broadcast %94 : vector<1x256xf32> to vector<4x256xf32>
    %97 = arith.mulf %95, %96 : vector<4x256xf32>
    %98 = arith.addf %87, %97 : vector<4x256xf32>
    %c0_23 = arith.constant 0 : index
    %c13 = arith.constant 13 : index
    %99 = vector.load %arg3[%c0_23, %c13] : memref<4x36xf32, #tpu.memory_space<vmem>>, vector<4x1xf32>
    %100 = vector.extract_strided_slice %92 {offsets = [1, 0], sizes = [1, 256], strides = [1, 1]} : vector<4x256xf32> to vector<1x256xf32>
    %101 = vector.broadcast %99 : vector<4x1xf32> to vector<4x256xf32>
    %102 = vector.broadcast %100 : vector<1x256xf32> to vector<4x256xf32>
    %103 = arith.mulf %101, %102 : vector<4x256xf32>
    %104 = arith.addf %98, %103 : vector<4x256xf32>
    %c0_24 = arith.constant 0 : index
    %c14 = arith.constant 14 : index
    %105 = vector.load %arg3[%c0_24, %c14] : memref<4x36xf32, #tpu.memory_space<vmem>>, vector<4x1xf32>
    %106 = vector.extract_strided_slice %92 {offsets = [2, 0], sizes = [1, 256], strides = [1, 1]} : vector<4x256xf32> to vector<1x256xf32>
    %107 = vector.broadcast %105 : vector<4x1xf32> to vector<4x256xf32>
    %108 = vector.broadcast %106 : vector<1x256xf32> to vector<4x256xf32>
    %109 = arith.mulf %107, %108 : vector<4x256xf32>
    %110 = arith.addf %104, %109 : vector<4x256xf32>
    %c0_25 = arith.constant 0 : index
    %c15 = arith.constant 15 : index
    %111 = vector.load %arg3[%c0_25, %c15] : memref<4x36xf32, #tpu.memory_space<vmem>>, vector<4x1xf32>
    %112 = vector.extract_strided_slice %92 {offsets = [3, 0], sizes = [1, 256], strides = [1, 1]} : vector<4x256xf32> to vector<1x256xf32>
    %113 = vector.broadcast %111 : vector<4x1xf32> to vector<4x256xf32>
    %114 = vector.broadcast %112 : vector<1x256xf32> to vector<4x256xf32>
    %115 = arith.mulf %113, %114 : vector<4x256xf32>
    %116 = arith.addf %110, %115 : vector<4x256xf32>
    %c0_26 = arith.constant 0 : index
    %c16 = arith.constant 16 : index
    %117 = vector.load %arg3[%c0_26, %c16] : memref<4x36xf32, #tpu.memory_space<vmem>>, vector<4x1xf32>
    %118 = vector.extract_strided_slice %1 {offsets = [0, 0], sizes = [1, 256], strides = [1, 1]} : vector<4x256xf32> to vector<1x256xf32>
    %119 = vector.broadcast %117 : vector<4x1xf32> to vector<4x256xf32>
    %120 = vector.broadcast %118 : vector<1x256xf32> to vector<4x256xf32>
    %121 = arith.mulf %119, %120 : vector<4x256xf32>
    %122 = arith.addf %116, %121 : vector<4x256xf32>
    %c0_27 = arith.constant 0 : index
    %c17 = arith.constant 17 : index
    %123 = vector.load %arg3[%c0_27, %c17] : memref<4x36xf32, #tpu.memory_space<vmem>>, vector<4x1xf32>
    %124 = vector.extract_strided_slice %1 {offsets = [1, 0], sizes = [1, 256], strides = [1, 1]} : vector<4x256xf32> to vector<1x256xf32>
    %125 = vector.broadcast %123 : vector<4x1xf32> to vector<4x256xf32>
    %126 = vector.broadcast %124 : vector<1x256xf32> to vector<4x256xf32>
    %127 = arith.mulf %125, %126 : vector<4x256xf32>
    %128 = arith.addf %122, %127 : vector<4x256xf32>
    %c0_28 = arith.constant 0 : index
    %c18 = arith.constant 18 : index
    %129 = vector.load %arg3[%c0_28, %c18] : memref<4x36xf32, #tpu.memory_space<vmem>>, vector<4x1xf32>
    %130 = vector.extract_strided_slice %1 {offsets = [2, 0], sizes = [1, 256], strides = [1, 1]} : vector<4x256xf32> to vector<1x256xf32>
    %131 = vector.broadcast %129 : vector<4x1xf32> to vector<4x256xf32>
    %132 = vector.broadcast %130 : vector<1x256xf32> to vector<4x256xf32>
    %133 = arith.mulf %131, %132 : vector<4x256xf32>
    %134 = arith.addf %128, %133 : vector<4x256xf32>
    %c0_29 = arith.constant 0 : index
    %c19 = arith.constant 19 : index
    %135 = vector.load %arg3[%c0_29, %c19] : memref<4x36xf32, #tpu.memory_space<vmem>>, vector<4x1xf32>
    %136 = vector.extract_strided_slice %1 {offsets = [3, 0], sizes = [1, 256], strides = [1, 1]} : vector<4x256xf32> to vector<1x256xf32>
    %137 = vector.broadcast %135 : vector<4x1xf32> to vector<4x256xf32>
    %138 = vector.broadcast %136 : vector<1x256xf32> to vector<4x256xf32>
    %139 = arith.mulf %137, %138 : vector<4x256xf32>
    %140 = arith.addf %134, %139 : vector<4x256xf32>
    %141 = vector.extract_strided_slice %1 {offsets = [0, 1], sizes = [4, 255], strides = [1, 1]} : vector<4x256xf32> to vector<4x255xf32>
    %cst_30 = arith.constant 0.000000e+00 : f32
    %142 = vector.broadcast %cst_30 : f32 to vector<4x1xf32>
    %143 = tpu.concatenate %141, %142 in 1 : vector<4x255xf32>, vector<4x1xf32> -> vector<4x256xf32>
    %144 = vector.broadcast %3 : vector<1x256xf32> to vector<4x256xf32>
    %145 = arith.mulf %143, %144 : vector<4x256xf32>
    %c0_31 = arith.constant 0 : index
    %c20 = arith.constant 20 : index
    %146 = vector.load %arg3[%c0_31, %c20] : memref<4x36xf32, #tpu.memory_space<vmem>>, vector<4x1xf32>
    %147 = vector.extract_strided_slice %145 {offsets = [0, 0], sizes = [1, 256], strides = [1, 1]} : vector<4x256xf32> to vector<1x256xf32>
    %148 = vector.broadcast %146 : vector<4x1xf32> to vector<4x256xf32>
    %149 = vector.broadcast %147 : vector<1x256xf32> to vector<4x256xf32>
    %150 = arith.mulf %148, %149 : vector<4x256xf32>
    %151 = arith.addf %140, %150 : vector<4x256xf32>
    %c0_32 = arith.constant 0 : index
    %c21 = arith.constant 21 : index
    %152 = vector.load %arg3[%c0_32, %c21] : memref<4x36xf32, #tpu.memory_space<vmem>>, vector<4x1xf32>
    %153 = vector.extract_strided_slice %145 {offsets = [1, 0], sizes = [1, 256], strides = [1, 1]} : vector<4x256xf32> to vector<1x256xf32>
    %154 = vector.broadcast %152 : vector<4x1xf32> to vector<4x256xf32>
    %155 = vector.broadcast %153 : vector<1x256xf32> to vector<4x256xf32>
    %156 = arith.mulf %154, %155 : vector<4x256xf32>
    %157 = arith.addf %151, %156 : vector<4x256xf32>
    %c0_33 = arith.constant 0 : index
    %c22 = arith.constant 22 : index
    %158 = vector.load %arg3[%c0_33, %c22] : memref<4x36xf32, #tpu.memory_space<vmem>>, vector<4x1xf32>
    %159 = vector.extract_strided_slice %145 {offsets = [2, 0], sizes = [1, 256], strides = [1, 1]} : vector<4x256xf32> to vector<1x256xf32>
    %160 = vector.broadcast %158 : vector<4x1xf32> to vector<4x256xf32>
    %161 = vector.broadcast %159 : vector<1x256xf32> to vector<4x256xf32>
    %162 = arith.mulf %160, %161 : vector<4x256xf32>
    %163 = arith.addf %157, %162 : vector<4x256xf32>
    %c0_34 = arith.constant 0 : index
    %c23 = arith.constant 23 : index
    %164 = vector.load %arg3[%c0_34, %c23] : memref<4x36xf32, #tpu.memory_space<vmem>>, vector<4x1xf32>
    %165 = vector.extract_strided_slice %145 {offsets = [3, 0], sizes = [1, 256], strides = [1, 1]} : vector<4x256xf32> to vector<1x256xf32>
    %166 = vector.broadcast %164 : vector<4x1xf32> to vector<4x256xf32>
    %167 = vector.broadcast %165 : vector<1x256xf32> to vector<4x256xf32>
    %168 = arith.mulf %166, %167 : vector<4x256xf32>
    %169 = arith.addf %163, %168 : vector<4x256xf32>
    %170 = vector.extract_strided_slice %1 {offsets = [0, 15], sizes = [4, 241], strides = [1, 1]} : vector<4x256xf32> to vector<4x241xf32>
    %cst_35 = arith.constant 0.000000e+00 : f32
    %171 = vector.broadcast %cst_35 : f32 to vector<4x15xf32>
    %172 = tpu.concatenate %170, %171 in 1 : vector<4x241xf32>, vector<4x15xf32> -> vector<4x256xf32>
    %173 = vector.broadcast %2 : vector<1x256xf32> to vector<4x256xf32>
    %174 = arith.mulf %172, %173 : vector<4x256xf32>
    %c0_36 = arith.constant 0 : index
    %c24 = arith.constant 24 : index
    %175 = vector.load %arg3[%c0_36, %c24] : memref<4x36xf32, #tpu.memory_space<vmem>>, vector<4x1xf32>
    %176 = vector.extract_strided_slice %174 {offsets = [0, 0], sizes = [1, 256], strides = [1, 1]} : vector<4x256xf32> to vector<1x256xf32>
    %177 = vector.broadcast %175 : vector<4x1xf32> to vector<4x256xf32>
    %178 = vector.broadcast %176 : vector<1x256xf32> to vector<4x256xf32>
    %179 = arith.mulf %177, %178 : vector<4x256xf32>
    %180 = arith.addf %169, %179 : vector<4x256xf32>
    %c0_37 = arith.constant 0 : index
    %c25 = arith.constant 25 : index
    %181 = vector.load %arg3[%c0_37, %c25] : memref<4x36xf32, #tpu.memory_space<vmem>>, vector<4x1xf32>
    %182 = vector.extract_strided_slice %174 {offsets = [1, 0], sizes = [1, 256], strides = [1, 1]} : vector<4x256xf32> to vector<1x256xf32>
    %183 = vector.broadcast %181 : vector<4x1xf32> to vector<4x256xf32>
    %184 = vector.broadcast %182 : vector<1x256xf32> to vector<4x256xf32>
    %185 = arith.mulf %183, %184 : vector<4x256xf32>
    %186 = arith.addf %180, %185 : vector<4x256xf32>
    %c0_38 = arith.constant 0 : index
    %c26 = arith.constant 26 : index
    %187 = vector.load %arg3[%c0_38, %c26] : memref<4x36xf32, #tpu.memory_space<vmem>>, vector<4x1xf32>
    %188 = vector.extract_strided_slice %174 {offsets = [2, 0], sizes = [1, 256], strides = [1, 1]} : vector<4x256xf32> to vector<1x256xf32>
    %189 = vector.broadcast %187 : vector<4x1xf32> to vector<4x256xf32>
    %190 = vector.broadcast %188 : vector<1x256xf32> to vector<4x256xf32>
    %191 = arith.mulf %189, %190 : vector<4x256xf32>
    %192 = arith.addf %186, %191 : vector<4x256xf32>
    %c0_39 = arith.constant 0 : index
    %c27 = arith.constant 27 : index
    %193 = vector.load %arg3[%c0_39, %c27] : memref<4x36xf32, #tpu.memory_space<vmem>>, vector<4x1xf32>
    %194 = vector.extract_strided_slice %174 {offsets = [3, 0], sizes = [1, 256], strides = [1, 1]} : vector<4x256xf32> to vector<1x256xf32>
    %195 = vector.broadcast %193 : vector<4x1xf32> to vector<4x256xf32>
    %196 = vector.broadcast %194 : vector<1x256xf32> to vector<4x256xf32>
    %197 = arith.mulf %195, %196 : vector<4x256xf32>
    %198 = arith.addf %192, %197 : vector<4x256xf32>
    %199 = vector.extract_strided_slice %1 {offsets = [0, 16], sizes = [4, 240], strides = [1, 1]} : vector<4x256xf32> to vector<4x240xf32>
    %cst_40 = arith.constant 0.000000e+00 : f32
    %200 = vector.broadcast %cst_40 : f32 to vector<4x16xf32>
    %201 = tpu.concatenate %199, %200 in 1 : vector<4x240xf32>, vector<4x16xf32> -> vector<4x256xf32>
    %c0_41 = arith.constant 0 : index
    %c28 = arith.constant 28 : index
    %202 = vector.load %arg3[%c0_41, %c28] : memref<4x36xf32, #tpu.memory_space<vmem>>, vector<4x1xf32>
    %203 = vector.extract_strided_slice %201 {offsets = [0, 0], sizes = [1, 256], strides = [1, 1]} : vector<4x256xf32> to vector<1x256xf32>
    %204 = vector.broadcast %202 : vector<4x1xf32> to vector<4x256xf32>
    %205 = vector.broadcast %203 : vector<1x256xf32> to vector<4x256xf32>
    %206 = arith.mulf %204, %205 : vector<4x256xf32>
    %207 = arith.addf %198, %206 : vector<4x256xf32>
    %c0_42 = arith.constant 0 : index
    %c29 = arith.constant 29 : index
    %208 = vector.load %arg3[%c0_42, %c29] : memref<4x36xf32, #tpu.memory_space<vmem>>, vector<4x1xf32>
    %209 = vector.extract_strided_slice %201 {offsets = [1, 0], sizes = [1, 256], strides = [1, 1]} : vector<4x256xf32> to vector<1x256xf32>
    %210 = vector.broadcast %208 : vector<4x1xf32> to vector<4x256xf32>
    %211 = vector.broadcast %209 : vector<1x256xf32> to vector<4x256xf32>
    %212 = arith.mulf %210, %211 : vector<4x256xf32>
    %213 = arith.addf %207, %212 : vector<4x256xf32>
    %c0_43 = arith.constant 0 : index
    %c30 = arith.constant 30 : index
    %214 = vector.load %arg3[%c0_43, %c30] : memref<4x36xf32, #tpu.memory_space<vmem>>, vector<4x1xf32>
    %215 = vector.extract_strided_slice %201 {offsets = [2, 0], sizes = [1, 256], strides = [1, 1]} : vector<4x256xf32> to vector<1x256xf32>
    %216 = vector.broadcast %214 : vector<4x1xf32> to vector<4x256xf32>
    %217 = vector.broadcast %215 : vector<1x256xf32> to vector<4x256xf32>
    %218 = arith.mulf %216, %217 : vector<4x256xf32>
    %219 = arith.addf %213, %218 : vector<4x256xf32>
    %c0_44 = arith.constant 0 : index
    %c31 = arith.constant 31 : index
    %220 = vector.load %arg3[%c0_44, %c31] : memref<4x36xf32, #tpu.memory_space<vmem>>, vector<4x1xf32>
    %221 = vector.extract_strided_slice %201 {offsets = [3, 0], sizes = [1, 256], strides = [1, 1]} : vector<4x256xf32> to vector<1x256xf32>
    %222 = vector.broadcast %220 : vector<4x1xf32> to vector<4x256xf32>
    %223 = vector.broadcast %221 : vector<1x256xf32> to vector<4x256xf32>
    %224 = arith.mulf %222, %223 : vector<4x256xf32>
    %225 = arith.addf %219, %224 : vector<4x256xf32>
    %226 = vector.extract_strided_slice %1 {offsets = [0, 17], sizes = [4, 239], strides = [1, 1]} : vector<4x256xf32> to vector<4x239xf32>
    %cst_45 = arith.constant 0.000000e+00 : f32
    %227 = vector.broadcast %cst_45 : f32 to vector<4x17xf32>
    %228 = tpu.concatenate %226, %227 in 1 : vector<4x239xf32>, vector<4x17xf32> -> vector<4x256xf32>
    %229 = vector.broadcast %3 : vector<1x256xf32> to vector<4x256xf32>
    %230 = arith.mulf %228, %229 : vector<4x256xf32>
    %c0_46 = arith.constant 0 : index
    %c32 = arith.constant 32 : index
    %231 = vector.load %arg3[%c0_46, %c32] : memref<4x36xf32, #tpu.memory_space<vmem>>, vector<4x1xf32>
    %232 = vector.extract_strided_slice %230 {offsets = [0, 0], sizes = [1, 256], strides = [1, 1]} : vector<4x256xf32> to vector<1x256xf32>
    %233 = vector.broadcast %231 : vector<4x1xf32> to vector<4x256xf32>
    %234 = vector.broadcast %232 : vector<1x256xf32> to vector<4x256xf32>
    %235 = arith.mulf %233, %234 : vector<4x256xf32>
    %236 = arith.addf %225, %235 : vector<4x256xf32>
    %c0_47 = arith.constant 0 : index
    %c33 = arith.constant 33 : index
    %237 = vector.load %arg3[%c0_47, %c33] : memref<4x36xf32, #tpu.memory_space<vmem>>, vector<4x1xf32>
    %238 = vector.extract_strided_slice %230 {offsets = [1, 0], sizes = [1, 256], strides = [1, 1]} : vector<4x256xf32> to vector<1x256xf32>
    %239 = vector.broadcast %237 : vector<4x1xf32> to vector<4x256xf32>
    %240 = vector.broadcast %238 : vector<1x256xf32> to vector<4x256xf32>
    %241 = arith.mulf %239, %240 : vector<4x256xf32>
    %242 = arith.addf %236, %241 : vector<4x256xf32>
    %c0_48 = arith.constant 0 : index
    %c34 = arith.constant 34 : index
    %243 = vector.load %arg3[%c0_48, %c34] : memref<4x36xf32, #tpu.memory_space<vmem>>, vector<4x1xf32>
    %244 = vector.extract_strided_slice %230 {offsets = [2, 0], sizes = [1, 256], strides = [1, 1]} : vector<4x256xf32> to vector<1x256xf32>
    %245 = vector.broadcast %243 : vector<4x1xf32> to vector<4x256xf32>
    %246 = vector.broadcast %244 : vector<1x256xf32> to vector<4x256xf32>
    %247 = arith.mulf %245, %246 : vector<4x256xf32>
    %248 = arith.addf %242, %247 : vector<4x256xf32>
    %c0_49 = arith.constant 0 : index
    %c35 = arith.constant 35 : index
    %249 = vector.load %arg3[%c0_49, %c35] : memref<4x36xf32, #tpu.memory_space<vmem>>, vector<4x1xf32>
    %250 = vector.extract_strided_slice %230 {offsets = [3, 0], sizes = [1, 256], strides = [1, 1]} : vector<4x256xf32> to vector<1x256xf32>
    %251 = vector.broadcast %249 : vector<4x1xf32> to vector<4x256xf32>
    %252 = vector.broadcast %250 : vector<1x256xf32> to vector<4x256xf32>
    %253 = arith.mulf %251, %252 : vector<4x256xf32>
    %254 = arith.addf %248, %253 : vector<4x256xf32>
    %c0_50 = arith.constant 0 : index
    %c0_51 = arith.constant 0 : index
    %255 = vector.load %arg5[%c0_50, %c0_51] : memref<4x1xf32, #tpu.memory_space<vmem>>, vector<4x1xf32>
    %256 = vector.broadcast %255 : vector<4x1xf32> to vector<4x256xf32>
    %257 = arith.addf %254, %256 : vector<4x256xf32>
    %cst_52 = arith.constant 0.000000e+00 : f32
    %258 = vector.broadcast %cst_52 : f32 to vector<4x256xf32>
    %259 = arith.maximumf %257, %258 : vector<4x256xf32>
    %c0_53 = arith.constant 0 : index
    %c0_54 = arith.constant 0 : index
    %260 = vector.load %arg6[%c0_53, %c0_54] : memref<4x1xf32, #tpu.memory_space<vmem>>, vector<4x1xf32>
    %261 = vector.broadcast %260 : vector<4x1xf32> to vector<4x256xf32>
    %262 = arith.addf %1, %261 : vector<4x256xf32>
    %cst_55 = arith.constant 0.000000e+00 : f32
    %263 = vector.broadcast %cst_55 : f32 to vector<4x17xf32>
    %264 = vector.extract_strided_slice %259 {offsets = [0, 0], sizes = [4, 239], strides = [1, 1]} : vector<4x256xf32> to vector<4x239xf32>
    %265 = tpu.concatenate %263, %264 in 1 : vector<4x17xf32>, vector<4x239xf32> -> vector<4x256xf32>
    %266 = vector.broadcast %2 : vector<1x256xf32> to vector<4x256xf32>
    %267 = arith.mulf %265, %266 : vector<4x256xf32>
    %c0_56 = arith.constant 0 : index
    %c0_57 = arith.constant 0 : index
    %268 = vector.load %arg4[%c0_56, %c0_57] : memref<4x36xf32, #tpu.memory_space<vmem>>, vector<4x1xf32>
    %269 = vector.extract_strided_slice %267 {offsets = [0, 0], sizes = [1, 256], strides = [1, 1]} : vector<4x256xf32> to vector<1x256xf32>
    %270 = vector.broadcast %268 : vector<4x1xf32> to vector<4x256xf32>
    %271 = vector.broadcast %269 : vector<1x256xf32> to vector<4x256xf32>
    %272 = arith.mulf %270, %271 : vector<4x256xf32>
    %273 = arith.addf %262, %272 : vector<4x256xf32>
    %c0_58 = arith.constant 0 : index
    %c1_59 = arith.constant 1 : index
    %274 = vector.load %arg4[%c0_58, %c1_59] : memref<4x36xf32, #tpu.memory_space<vmem>>, vector<4x1xf32>
    %275 = vector.extract_strided_slice %267 {offsets = [1, 0], sizes = [1, 256], strides = [1, 1]} : vector<4x256xf32> to vector<1x256xf32>
    %276 = vector.broadcast %274 : vector<4x1xf32> to vector<4x256xf32>
    %277 = vector.broadcast %275 : vector<1x256xf32> to vector<4x256xf32>
    %278 = arith.mulf %276, %277 : vector<4x256xf32>
    %279 = arith.addf %273, %278 : vector<4x256xf32>
    %c0_60 = arith.constant 0 : index
    %c2_61 = arith.constant 2 : index
    %280 = vector.load %arg4[%c0_60, %c2_61] : memref<4x36xf32, #tpu.memory_space<vmem>>, vector<4x1xf32>
    %281 = vector.extract_strided_slice %267 {offsets = [2, 0], sizes = [1, 256], strides = [1, 1]} : vector<4x256xf32> to vector<1x256xf32>
    %282 = vector.broadcast %280 : vector<4x1xf32> to vector<4x256xf32>
    %283 = vector.broadcast %281 : vector<1x256xf32> to vector<4x256xf32>
    %284 = arith.mulf %282, %283 : vector<4x256xf32>
    %285 = arith.addf %279, %284 : vector<4x256xf32>
    %c0_62 = arith.constant 0 : index
    %c3_63 = arith.constant 3 : index
    %286 = vector.load %arg4[%c0_62, %c3_63] : memref<4x36xf32, #tpu.memory_space<vmem>>, vector<4x1xf32>
    %287 = vector.extract_strided_slice %267 {offsets = [3, 0], sizes = [1, 256], strides = [1, 1]} : vector<4x256xf32> to vector<1x256xf32>
    %288 = vector.broadcast %286 : vector<4x1xf32> to vector<4x256xf32>
    %289 = vector.broadcast %287 : vector<1x256xf32> to vector<4x256xf32>
    %290 = arith.mulf %288, %289 : vector<4x256xf32>
    %291 = arith.addf %285, %290 : vector<4x256xf32>
    %cst_64 = arith.constant 0.000000e+00 : f32
    %292 = vector.broadcast %cst_64 : f32 to vector<4x16xf32>
    %293 = vector.extract_strided_slice %259 {offsets = [0, 0], sizes = [4, 240], strides = [1, 1]} : vector<4x256xf32> to vector<4x240xf32>
    %294 = tpu.concatenate %292, %293 in 1 : vector<4x16xf32>, vector<4x240xf32> -> vector<4x256xf32>
    %c0_65 = arith.constant 0 : index
    %c4_66 = arith.constant 4 : index
    %295 = vector.load %arg4[%c0_65, %c4_66] : memref<4x36xf32, #tpu.memory_space<vmem>>, vector<4x1xf32>
    %296 = vector.extract_strided_slice %294 {offsets = [0, 0], sizes = [1, 256], strides = [1, 1]} : vector<4x256xf32> to vector<1x256xf32>
    %297 = vector.broadcast %295 : vector<4x1xf32> to vector<4x256xf32>
    %298 = vector.broadcast %296 : vector<1x256xf32> to vector<4x256xf32>
    %299 = arith.mulf %297, %298 : vector<4x256xf32>
    %300 = arith.addf %291, %299 : vector<4x256xf32>
    %c0_67 = arith.constant 0 : index
    %c5_68 = arith.constant 5 : index
    %301 = vector.load %arg4[%c0_67, %c5_68] : memref<4x36xf32, #tpu.memory_space<vmem>>, vector<4x1xf32>
    %302 = vector.extract_strided_slice %294 {offsets = [1, 0], sizes = [1, 256], strides = [1, 1]} : vector<4x256xf32> to vector<1x256xf32>
    %303 = vector.broadcast %301 : vector<4x1xf32> to vector<4x256xf32>
    %304 = vector.broadcast %302 : vector<1x256xf32> to vector<4x256xf32>
    %305 = arith.mulf %303, %304 : vector<4x256xf32>
    %306 = arith.addf %300, %305 : vector<4x256xf32>
    %c0_69 = arith.constant 0 : index
    %c6_70 = arith.constant 6 : index
    %307 = vector.load %arg4[%c0_69, %c6_70] : memref<4x36xf32, #tpu.memory_space<vmem>>, vector<4x1xf32>
    %308 = vector.extract_strided_slice %294 {offsets = [2, 0], sizes = [1, 256], strides = [1, 1]} : vector<4x256xf32> to vector<1x256xf32>
    %309 = vector.broadcast %307 : vector<4x1xf32> to vector<4x256xf32>
    %310 = vector.broadcast %308 : vector<1x256xf32> to vector<4x256xf32>
    %311 = arith.mulf %309, %310 : vector<4x256xf32>
    %312 = arith.addf %306, %311 : vector<4x256xf32>
    %c0_71 = arith.constant 0 : index
    %c7_72 = arith.constant 7 : index
    %313 = vector.load %arg4[%c0_71, %c7_72] : memref<4x36xf32, #tpu.memory_space<vmem>>, vector<4x1xf32>
    %314 = vector.extract_strided_slice %294 {offsets = [3, 0], sizes = [1, 256], strides = [1, 1]} : vector<4x256xf32> to vector<1x256xf32>
    %315 = vector.broadcast %313 : vector<4x1xf32> to vector<4x256xf32>
    %316 = vector.broadcast %314 : vector<1x256xf32> to vector<4x256xf32>
    %317 = arith.mulf %315, %316 : vector<4x256xf32>
    %318 = arith.addf %312, %317 : vector<4x256xf32>
    %cst_73 = arith.constant 0.000000e+00 : f32
    %319 = vector.broadcast %cst_73 : f32 to vector<4x15xf32>
    %320 = vector.extract_strided_slice %259 {offsets = [0, 0], sizes = [4, 241], strides = [1, 1]} : vector<4x256xf32> to vector<4x241xf32>
    %321 = tpu.concatenate %319, %320 in 1 : vector<4x15xf32>, vector<4x241xf32> -> vector<4x256xf32>
    %322 = vector.broadcast %3 : vector<1x256xf32> to vector<4x256xf32>
    %323 = arith.mulf %321, %322 : vector<4x256xf32>
    %c0_74 = arith.constant 0 : index
    %c8_75 = arith.constant 8 : index
    %324 = vector.load %arg4[%c0_74, %c8_75] : memref<4x36xf32, #tpu.memory_space<vmem>>, vector<4x1xf32>
    %325 = vector.extract_strided_slice %323 {offsets = [0, 0], sizes = [1, 256], strides = [1, 1]} : vector<4x256xf32> to vector<1x256xf32>
    %326 = vector.broadcast %324 : vector<4x1xf32> to vector<4x256xf32>
    %327 = vector.broadcast %325 : vector<1x256xf32> to vector<4x256xf32>
    %328 = arith.mulf %326, %327 : vector<4x256xf32>
    %329 = arith.addf %318, %328 : vector<4x256xf32>
    %c0_76 = arith.constant 0 : index
    %c9_77 = arith.constant 9 : index
    %330 = vector.load %arg4[%c0_76, %c9_77] : memref<4x36xf32, #tpu.memory_space<vmem>>, vector<4x1xf32>
    %331 = vector.extract_strided_slice %323 {offsets = [1, 0], sizes = [1, 256], strides = [1, 1]} : vector<4x256xf32> to vector<1x256xf32>
    %332 = vector.broadcast %330 : vector<4x1xf32> to vector<4x256xf32>
    %333 = vector.broadcast %331 : vector<1x256xf32> to vector<4x256xf32>
    %334 = arith.mulf %332, %333 : vector<4x256xf32>
    %335 = arith.addf %329, %334 : vector<4x256xf32>
    %c0_78 = arith.constant 0 : index
    %c10_79 = arith.constant 10 : index
    %336 = vector.load %arg4[%c0_78, %c10_79] : memref<4x36xf32, #tpu.memory_space<vmem>>, vector<4x1xf32>
    %337 = vector.extract_strided_slice %323 {offsets = [2, 0], sizes = [1, 256], strides = [1, 1]} : vector<4x256xf32> to vector<1x256xf32>
    %338 = vector.broadcast %336 : vector<4x1xf32> to vector<4x256xf32>
    %339 = vector.broadcast %337 : vector<1x256xf32> to vector<4x256xf32>
    %340 = arith.mulf %338, %339 : vector<4x256xf32>
    %341 = arith.addf %335, %340 : vector<4x256xf32>
    %c0_80 = arith.constant 0 : index
    %c11_81 = arith.constant 11 : index
    %342 = vector.load %arg4[%c0_80, %c11_81] : memref<4x36xf32, #tpu.memory_space<vmem>>, vector<4x1xf32>
    %343 = vector.extract_strided_slice %323 {offsets = [3, 0], sizes = [1, 256], strides = [1, 1]} : vector<4x256xf32> to vector<1x256xf32>
    %344 = vector.broadcast %342 : vector<4x1xf32> to vector<4x256xf32>
    %345 = vector.broadcast %343 : vector<1x256xf32> to vector<4x256xf32>
    %346 = arith.mulf %344, %345 : vector<4x256xf32>
    %347 = arith.addf %341, %346 : vector<4x256xf32>
    %cst_82 = arith.constant 0.000000e+00 : f32
    %348 = vector.broadcast %cst_82 : f32 to vector<4x1xf32>
    %349 = vector.extract_strided_slice %259 {offsets = [0, 0], sizes = [4, 255], strides = [1, 1]} : vector<4x256xf32> to vector<4x255xf32>
    %350 = tpu.concatenate %348, %349 in 1 : vector<4x1xf32>, vector<4x255xf32> -> vector<4x256xf32>
    %351 = vector.broadcast %2 : vector<1x256xf32> to vector<4x256xf32>
    %352 = arith.mulf %350, %351 : vector<4x256xf32>
    %c0_83 = arith.constant 0 : index
    %c12_84 = arith.constant 12 : index
    %353 = vector.load %arg4[%c0_83, %c12_84] : memref<4x36xf32, #tpu.memory_space<vmem>>, vector<4x1xf32>
    %354 = vector.extract_strided_slice %352 {offsets = [0, 0], sizes = [1, 256], strides = [1, 1]} : vector<4x256xf32> to vector<1x256xf32>
    %355 = vector.broadcast %353 : vector<4x1xf32> to vector<4x256xf32>
    %356 = vector.broadcast %354 : vector<1x256xf32> to vector<4x256xf32>
    %357 = arith.mulf %355, %356 : vector<4x256xf32>
    %358 = arith.addf %347, %357 : vector<4x256xf32>
    %c0_85 = arith.constant 0 : index
    %c13_86 = arith.constant 13 : index
    %359 = vector.load %arg4[%c0_85, %c13_86] : memref<4x36xf32, #tpu.memory_space<vmem>>, vector<4x1xf32>
    %360 = vector.extract_strided_slice %352 {offsets = [1, 0], sizes = [1, 256], strides = [1, 1]} : vector<4x256xf32> to vector<1x256xf32>
    %361 = vector.broadcast %359 : vector<4x1xf32> to vector<4x256xf32>
    %362 = vector.broadcast %360 : vector<1x256xf32> to vector<4x256xf32>
    %363 = arith.mulf %361, %362 : vector<4x256xf32>
    %364 = arith.addf %358, %363 : vector<4x256xf32>
    %c0_87 = arith.constant 0 : index
    %c14_88 = arith.constant 14 : index
    %365 = vector.load %arg4[%c0_87, %c14_88] : memref<4x36xf32, #tpu.memory_space<vmem>>, vector<4x1xf32>
    %366 = vector.extract_strided_slice %352 {offsets = [2, 0], sizes = [1, 256], strides = [1, 1]} : vector<4x256xf32> to vector<1x256xf32>
    %367 = vector.broadcast %365 : vector<4x1xf32> to vector<4x256xf32>
    %368 = vector.broadcast %366 : vector<1x256xf32> to vector<4x256xf32>
    %369 = arith.mulf %367, %368 : vector<4x256xf32>
    %370 = arith.addf %364, %369 : vector<4x256xf32>
    %c0_89 = arith.constant 0 : index
    %c15_90 = arith.constant 15 : index
    %371 = vector.load %arg4[%c0_89, %c15_90] : memref<4x36xf32, #tpu.memory_space<vmem>>, vector<4x1xf32>
    %372 = vector.extract_strided_slice %352 {offsets = [3, 0], sizes = [1, 256], strides = [1, 1]} : vector<4x256xf32> to vector<1x256xf32>
    %373 = vector.broadcast %371 : vector<4x1xf32> to vector<4x256xf32>
    %374 = vector.broadcast %372 : vector<1x256xf32> to vector<4x256xf32>
    %375 = arith.mulf %373, %374 : vector<4x256xf32>
    %376 = arith.addf %370, %375 : vector<4x256xf32>
    %c0_91 = arith.constant 0 : index
    %c16_92 = arith.constant 16 : index
    %377 = vector.load %arg4[%c0_91, %c16_92] : memref<4x36xf32, #tpu.memory_space<vmem>>, vector<4x1xf32>
    %378 = vector.extract_strided_slice %259 {offsets = [0, 0], sizes = [1, 256], strides = [1, 1]} : vector<4x256xf32> to vector<1x256xf32>
    %379 = vector.broadcast %377 : vector<4x1xf32> to vector<4x256xf32>
    %380 = vector.broadcast %378 : vector<1x256xf32> to vector<4x256xf32>
    %381 = arith.mulf %379, %380 : vector<4x256xf32>
    %382 = arith.addf %376, %381 : vector<4x256xf32>
    %c0_93 = arith.constant 0 : index
    %c17_94 = arith.constant 17 : index
    %383 = vector.load %arg4[%c0_93, %c17_94] : memref<4x36xf32, #tpu.memory_space<vmem>>, vector<4x1xf32>
    %384 = vector.extract_strided_slice %259 {offsets = [1, 0], sizes = [1, 256], strides = [1, 1]} : vector<4x256xf32> to vector<1x256xf32>
    %385 = vector.broadcast %383 : vector<4x1xf32> to vector<4x256xf32>
    %386 = vector.broadcast %384 : vector<1x256xf32> to vector<4x256xf32>
    %387 = arith.mulf %385, %386 : vector<4x256xf32>
    %388 = arith.addf %382, %387 : vector<4x256xf32>
    %c0_95 = arith.constant 0 : index
    %c18_96 = arith.constant 18 : index
    %389 = vector.load %arg4[%c0_95, %c18_96] : memref<4x36xf32, #tpu.memory_space<vmem>>, vector<4x1xf32>
    %390 = vector.extract_strided_slice %259 {offsets = [2, 0], sizes = [1, 256], strides = [1, 1]} : vector<4x256xf32> to vector<1x256xf32>
    %391 = vector.broadcast %389 : vector<4x1xf32> to vector<4x256xf32>
    %392 = vector.broadcast %390 : vector<1x256xf32> to vector<4x256xf32>
    %393 = arith.mulf %391, %392 : vector<4x256xf32>
    %394 = arith.addf %388, %393 : vector<4x256xf32>
    %c0_97 = arith.constant 0 : index
    %c19_98 = arith.constant 19 : index
    %395 = vector.load %arg4[%c0_97, %c19_98] : memref<4x36xf32, #tpu.memory_space<vmem>>, vector<4x1xf32>
    %396 = vector.extract_strided_slice %259 {offsets = [3, 0], sizes = [1, 256], strides = [1, 1]} : vector<4x256xf32> to vector<1x256xf32>
    %397 = vector.broadcast %395 : vector<4x1xf32> to vector<4x256xf32>
    %398 = vector.broadcast %396 : vector<1x256xf32> to vector<4x256xf32>
    %399 = arith.mulf %397, %398 : vector<4x256xf32>
    %400 = arith.addf %394, %399 : vector<4x256xf32>
    %401 = vector.extract_strided_slice %259 {offsets = [0, 1], sizes = [4, 255], strides = [1, 1]} : vector<4x256xf32> to vector<4x255xf32>
    %cst_99 = arith.constant 0.000000e+00 : f32
    %402 = vector.broadcast %cst_99 : f32 to vector<4x1xf32>
    %403 = tpu.concatenate %401, %402 in 1 : vector<4x255xf32>, vector<4x1xf32> -> vector<4x256xf32>
    %404 = vector.broadcast %3 : vector<1x256xf32> to vector<4x256xf32>
    %405 = arith.mulf %403, %404 : vector<4x256xf32>
    %c0_100 = arith.constant 0 : index
    %c20_101 = arith.constant 20 : index
    %406 = vector.load %arg4[%c0_100, %c20_101] : memref<4x36xf32, #tpu.memory_space<vmem>>, vector<4x1xf32>
    %407 = vector.extract_strided_slice %405 {offsets = [0, 0], sizes = [1, 256], strides = [1, 1]} : vector<4x256xf32> to vector<1x256xf32>
    %408 = vector.broadcast %406 : vector<4x1xf32> to vector<4x256xf32>
    %409 = vector.broadcast %407 : vector<1x256xf32> to vector<4x256xf32>
    %410 = arith.mulf %408, %409 : vector<4x256xf32>
    %411 = arith.addf %400, %410 : vector<4x256xf32>
    %c0_102 = arith.constant 0 : index
    %c21_103 = arith.constant 21 : index
    %412 = vector.load %arg4[%c0_102, %c21_103] : memref<4x36xf32, #tpu.memory_space<vmem>>, vector<4x1xf32>
    %413 = vector.extract_strided_slice %405 {offsets = [1, 0], sizes = [1, 256], strides = [1, 1]} : vector<4x256xf32> to vector<1x256xf32>
    %414 = vector.broadcast %412 : vector<4x1xf32> to vector<4x256xf32>
    %415 = vector.broadcast %413 : vector<1x256xf32> to vector<4x256xf32>
    %416 = arith.mulf %414, %415 : vector<4x256xf32>
    %417 = arith.addf %411, %416 : vector<4x256xf32>
    %c0_104 = arith.constant 0 : index
    %c22_105 = arith.constant 22 : index
    %418 = vector.load %arg4[%c0_104, %c22_105] : memref<4x36xf32, #tpu.memory_space<vmem>>, vector<4x1xf32>
    %419 = vector.extract_strided_slice %405 {offsets = [2, 0], sizes = [1, 256], strides = [1, 1]} : vector<4x256xf32> to vector<1x256xf32>
    %420 = vector.broadcast %418 : vector<4x1xf32> to vector<4x256xf32>
    %421 = vector.broadcast %419 : vector<1x256xf32> to vector<4x256xf32>
    %422 = arith.mulf %420, %421 : vector<4x256xf32>
    %423 = arith.addf %417, %422 : vector<4x256xf32>
    %c0_106 = arith.constant 0 : index
    %c23_107 = arith.constant 23 : index
    %424 = vector.load %arg4[%c0_106, %c23_107] : memref<4x36xf32, #tpu.memory_space<vmem>>, vector<4x1xf32>
    %425 = vector.extract_strided_slice %405 {offsets = [3, 0], sizes = [1, 256], strides = [1, 1]} : vector<4x256xf32> to vector<1x256xf32>
    %426 = vector.broadcast %424 : vector<4x1xf32> to vector<4x256xf32>
    %427 = vector.broadcast %425 : vector<1x256xf32> to vector<4x256xf32>
    %428 = arith.mulf %426, %427 : vector<4x256xf32>
    %429 = arith.addf %423, %428 : vector<4x256xf32>
    %430 = vector.extract_strided_slice %259 {offsets = [0, 15], sizes = [4, 241], strides = [1, 1]} : vector<4x256xf32> to vector<4x241xf32>
    %cst_108 = arith.constant 0.000000e+00 : f32
    %431 = vector.broadcast %cst_108 : f32 to vector<4x15xf32>
    %432 = tpu.concatenate %430, %431 in 1 : vector<4x241xf32>, vector<4x15xf32> -> vector<4x256xf32>
    %433 = vector.broadcast %2 : vector<1x256xf32> to vector<4x256xf32>
    %434 = arith.mulf %432, %433 : vector<4x256xf32>
    %c0_109 = arith.constant 0 : index
    %c24_110 = arith.constant 24 : index
    %435 = vector.load %arg4[%c0_109, %c24_110] : memref<4x36xf32, #tpu.memory_space<vmem>>, vector<4x1xf32>
    %436 = vector.extract_strided_slice %434 {offsets = [0, 0], sizes = [1, 256], strides = [1, 1]} : vector<4x256xf32> to vector<1x256xf32>
    %437 = vector.broadcast %435 : vector<4x1xf32> to vector<4x256xf32>
    %438 = vector.broadcast %436 : vector<1x256xf32> to vector<4x256xf32>
    %439 = arith.mulf %437, %438 : vector<4x256xf32>
    %440 = arith.addf %429, %439 : vector<4x256xf32>
    %c0_111 = arith.constant 0 : index
    %c25_112 = arith.constant 25 : index
    %441 = vector.load %arg4[%c0_111, %c25_112] : memref<4x36xf32, #tpu.memory_space<vmem>>, vector<4x1xf32>
    %442 = vector.extract_strided_slice %434 {offsets = [1, 0], sizes = [1, 256], strides = [1, 1]} : vector<4x256xf32> to vector<1x256xf32>
    %443 = vector.broadcast %441 : vector<4x1xf32> to vector<4x256xf32>
    %444 = vector.broadcast %442 : vector<1x256xf32> to vector<4x256xf32>
    %445 = arith.mulf %443, %444 : vector<4x256xf32>
    %446 = arith.addf %440, %445 : vector<4x256xf32>
    %c0_113 = arith.constant 0 : index
    %c26_114 = arith.constant 26 : index
    %447 = vector.load %arg4[%c0_113, %c26_114] : memref<4x36xf32, #tpu.memory_space<vmem>>, vector<4x1xf32>
    %448 = vector.extract_strided_slice %434 {offsets = [2, 0], sizes = [1, 256], strides = [1, 1]} : vector<4x256xf32> to vector<1x256xf32>
    %449 = vector.broadcast %447 : vector<4x1xf32> to vector<4x256xf32>
    %450 = vector.broadcast %448 : vector<1x256xf32> to vector<4x256xf32>
    %451 = arith.mulf %449, %450 : vector<4x256xf32>
    %452 = arith.addf %446, %451 : vector<4x256xf32>
    %c0_115 = arith.constant 0 : index
    %c27_116 = arith.constant 27 : index
    %453 = vector.load %arg4[%c0_115, %c27_116] : memref<4x36xf32, #tpu.memory_space<vmem>>, vector<4x1xf32>
    %454 = vector.extract_strided_slice %434 {offsets = [3, 0], sizes = [1, 256], strides = [1, 1]} : vector<4x256xf32> to vector<1x256xf32>
    %455 = vector.broadcast %453 : vector<4x1xf32> to vector<4x256xf32>
    %456 = vector.broadcast %454 : vector<1x256xf32> to vector<4x256xf32>
    %457 = arith.mulf %455, %456 : vector<4x256xf32>
    %458 = arith.addf %452, %457 : vector<4x256xf32>
    %459 = vector.extract_strided_slice %259 {offsets = [0, 16], sizes = [4, 240], strides = [1, 1]} : vector<4x256xf32> to vector<4x240xf32>
    %cst_117 = arith.constant 0.000000e+00 : f32
    %460 = vector.broadcast %cst_117 : f32 to vector<4x16xf32>
    %461 = tpu.concatenate %459, %460 in 1 : vector<4x240xf32>, vector<4x16xf32> -> vector<4x256xf32>
    %c0_118 = arith.constant 0 : index
    %c28_119 = arith.constant 28 : index
    %462 = vector.load %arg4[%c0_118, %c28_119] : memref<4x36xf32, #tpu.memory_space<vmem>>, vector<4x1xf32>
    %463 = vector.extract_strided_slice %461 {offsets = [0, 0], sizes = [1, 256], strides = [1, 1]} : vector<4x256xf32> to vector<1x256xf32>
    %464 = vector.broadcast %462 : vector<4x1xf32> to vector<4x256xf32>
    %465 = vector.broadcast %463 : vector<1x256xf32> to vector<4x256xf32>
    %466 = arith.mulf %464, %465 : vector<4x256xf32>
    %467 = arith.addf %458, %466 : vector<4x256xf32>
    %c0_120 = arith.constant 0 : index
    %c29_121 = arith.constant 29 : index
    %468 = vector.load %arg4[%c0_120, %c29_121] : memref<4x36xf32, #tpu.memory_space<vmem>>, vector<4x1xf32>
    %469 = vector.extract_strided_slice %461 {offsets = [1, 0], sizes = [1, 256], strides = [1, 1]} : vector<4x256xf32> to vector<1x256xf32>
    %470 = vector.broadcast %468 : vector<4x1xf32> to vector<4x256xf32>
    %471 = vector.broadcast %469 : vector<1x256xf32> to vector<4x256xf32>
    %472 = arith.mulf %470, %471 : vector<4x256xf32>
    %473 = arith.addf %467, %472 : vector<4x256xf32>
    %c0_122 = arith.constant 0 : index
    %c30_123 = arith.constant 30 : index
    %474 = vector.load %arg4[%c0_122, %c30_123] : memref<4x36xf32, #tpu.memory_space<vmem>>, vector<4x1xf32>
    %475 = vector.extract_strided_slice %461 {offsets = [2, 0], sizes = [1, 256], strides = [1, 1]} : vector<4x256xf32> to vector<1x256xf32>
    %476 = vector.broadcast %474 : vector<4x1xf32> to vector<4x256xf32>
    %477 = vector.broadcast %475 : vector<1x256xf32> to vector<4x256xf32>
    %478 = arith.mulf %476, %477 : vector<4x256xf32>
    %479 = arith.addf %473, %478 : vector<4x256xf32>
    %c0_124 = arith.constant 0 : index
    %c31_125 = arith.constant 31 : index
    %480 = vector.load %arg4[%c0_124, %c31_125] : memref<4x36xf32, #tpu.memory_space<vmem>>, vector<4x1xf32>
    %481 = vector.extract_strided_slice %461 {offsets = [3, 0], sizes = [1, 256], strides = [1, 1]} : vector<4x256xf32> to vector<1x256xf32>
    %482 = vector.broadcast %480 : vector<4x1xf32> to vector<4x256xf32>
    %483 = vector.broadcast %481 : vector<1x256xf32> to vector<4x256xf32>
    %484 = arith.mulf %482, %483 : vector<4x256xf32>
    %485 = arith.addf %479, %484 : vector<4x256xf32>
    %486 = vector.extract_strided_slice %259 {offsets = [0, 17], sizes = [4, 239], strides = [1, 1]} : vector<4x256xf32> to vector<4x239xf32>
    %cst_126 = arith.constant 0.000000e+00 : f32
    %487 = vector.broadcast %cst_126 : f32 to vector<4x17xf32>
    %488 = tpu.concatenate %486, %487 in 1 : vector<4x239xf32>, vector<4x17xf32> -> vector<4x256xf32>
    %489 = vector.broadcast %3 : vector<1x256xf32> to vector<4x256xf32>
    %490 = arith.mulf %488, %489 : vector<4x256xf32>
    %c0_127 = arith.constant 0 : index
    %c32_128 = arith.constant 32 : index
    %491 = vector.load %arg4[%c0_127, %c32_128] : memref<4x36xf32, #tpu.memory_space<vmem>>, vector<4x1xf32>
    %492 = vector.extract_strided_slice %490 {offsets = [0, 0], sizes = [1, 256], strides = [1, 1]} : vector<4x256xf32> to vector<1x256xf32>
    %493 = vector.broadcast %491 : vector<4x1xf32> to vector<4x256xf32>
    %494 = vector.broadcast %492 : vector<1x256xf32> to vector<4x256xf32>
    %495 = arith.mulf %493, %494 : vector<4x256xf32>
    %496 = arith.addf %485, %495 : vector<4x256xf32>
    %c0_129 = arith.constant 0 : index
    %c33_130 = arith.constant 33 : index
    %497 = vector.load %arg4[%c0_129, %c33_130] : memref<4x36xf32, #tpu.memory_space<vmem>>, vector<4x1xf32>
    %498 = vector.extract_strided_slice %490 {offsets = [1, 0], sizes = [1, 256], strides = [1, 1]} : vector<4x256xf32> to vector<1x256xf32>
    %499 = vector.broadcast %497 : vector<4x1xf32> to vector<4x256xf32>
    %500 = vector.broadcast %498 : vector<1x256xf32> to vector<4x256xf32>
    %501 = arith.mulf %499, %500 : vector<4x256xf32>
    %502 = arith.addf %496, %501 : vector<4x256xf32>
    %c0_131 = arith.constant 0 : index
    %c34_132 = arith.constant 34 : index
    %503 = vector.load %arg4[%c0_131, %c34_132] : memref<4x36xf32, #tpu.memory_space<vmem>>, vector<4x1xf32>
    %504 = vector.extract_strided_slice %490 {offsets = [2, 0], sizes = [1, 256], strides = [1, 1]} : vector<4x256xf32> to vector<1x256xf32>
    %505 = vector.broadcast %503 : vector<4x1xf32> to vector<4x256xf32>
    %506 = vector.broadcast %504 : vector<1x256xf32> to vector<4x256xf32>
    %507 = arith.mulf %505, %506 : vector<4x256xf32>
    %508 = arith.addf %502, %507 : vector<4x256xf32>
    %c0_133 = arith.constant 0 : index
    %c35_134 = arith.constant 35 : index
    %509 = vector.load %arg4[%c0_133, %c35_134] : memref<4x36xf32, #tpu.memory_space<vmem>>, vector<4x1xf32>
    %510 = vector.extract_strided_slice %490 {offsets = [3, 0], sizes = [1, 256], strides = [1, 1]} : vector<4x256xf32> to vector<1x256xf32>
    %511 = vector.broadcast %509 : vector<4x1xf32> to vector<4x256xf32>
    %512 = vector.broadcast %510 : vector<1x256xf32> to vector<4x256xf32>
    %513 = arith.mulf %511, %512 : vector<4x256xf32>
    %514 = arith.addf %508, %513 : vector<4x256xf32>
    %cst_135 = arith.constant 0.000000e+00 : f32
    %515 = vector.broadcast %cst_135 : f32 to vector<4x256xf32>
    %516 = arith.maximumf %514, %515 : vector<4x256xf32>
    %c0_136 = arith.constant 0 : index
    %c0_137 = arith.constant 0 : index
    %c0_138 = arith.constant 0 : index
    %517 = vector.load %arg7[%c0_136, %c0_137, %c0_138] : memref<1x4x256xf32, #tpu.memory_space<vmem>>, vector<1x4x256xf32>
    %518 = vector.shape_cast %517 : vector<1x4x256xf32> to vector<4x256xf32>
    %519 = vector.shape_cast %516 : vector<4x256xf32> to vector<1x4x256xf32>
    tpu.vector_store %arg7[%c0_136, %c0_137, %c0_138], %519 {strides = array<i32>} : memref<1x4x256xf32, #tpu.memory_space<vmem>>, vector<1x4x256xf32>,
    return
  }
  func.func @transform_0(%arg0: i32) -> (i32, i32, i32) {
    %c0_i32 = arith.constant 0 : i32
    %c0_i32_0 = arith.constant 0 : i32
    %c0_i32_1 = arith.constant 0 : i32
    return %arg0, %c0_i32, %c0_i32_0 : i32, i32, i32
  }
  func.func @transform_1(%arg0: i32) -> (i32, i32) {
    %c0_i32 = arith.constant 0 : i32
    %c0_i32_0 = arith.constant 0 : i32
    %c0_i32_1 = arith.constant 0 : i32
    return %c0_i32, %c0_i32_0 : i32, i32
  }
  func.func @transform_2(%arg0: i32) -> (i32, i32) {
    %c0_i32 = arith.constant 0 : i32
    %c0_i32_0 = arith.constant 0 : i32
    %c0_i32_1 = arith.constant 0 : i32
    return %c0_i32, %c0_i32_0 : i32, i32
  }
  func.func @transform_3(%arg0: i32) -> (i32, i32) {
    %c0_i32 = arith.constant 0 : i32
    %c0_i32_0 = arith.constant 0 : i32
    %c0_i32_1 = arith.constant 0 : i32
    return %c0_i32, %c0_i32_0 : i32, i32
  }
  func.func @transform_4(%arg0: i32) -> (i32, i32) {
    %c0_i32 = arith.constant 0 : i32
    %c0_i32_0 = arith.constant 0 : i32
    %c0_i32_1 = arith.constant 0 : i32
    return %c0_i32, %c0_i32_0 : i32, i32
  }
  func.func @transform_5(%arg0: i32) -> (i32, i32) {
    %c0_i32 = arith.constant 0 : i32
    %c0_i32_0 = arith.constant 0 : i32
    %c0_i32_1 = arith.constant 0 : i32
    return %c0_i32, %c0_i32_0 : i32, i32
  }
  func.func @transform_6(%arg0: i32) -> (i32, i32, i32) {
    %c0_i32 = arith.constant 0 : i32
    %c0_i32_0 = arith.constant 0 : i32
    %c0_i32_1 = arith.constant 0 : i32
    return %arg0, %c0_i32, %c0_i32_0 : i32, i32, i32
  }
}

</mosaic_0001>

<bundles_post_ra>
// kernel: resblock_pallas.1
= control target key start
LH: loop header
LB: loop body
LE: loop exit
PB: predicated region body
PF: predicated region fallthrough
CT: control target
= control target key end

     0   :  { %s1657_s21 = smov 0   ;;  %s2184_s0 = inlined_call_operand.vmem [shape: f32[2,4,256], index: 0, kind: input, shape index: {}]   ;;  %s2185_s1 = inlined_call_operand.vmem [shape: f32[2,256], index: 1, kind: input, shape index: {}]   ;;  %s2186_s2 = inlined_call_operand.vmem [shape: f32[4,36], index: 2, kind: input, shape index: {}]   ;;  %s2187_s3 = inlined_call_operand.vmem [shape: f32[4,36], index: 3, kind: input, shape index: {}]   ;;  %s2188_s4 = inlined_call_operand.vmem [shape: f32[4,1], index: 4, kind: input, shape index: {}]   ;;  %s2189_s5 = inlined_call_operand.vmem [shape: f32[4,1], index: 5, kind: input, shape index: {}]   ;;  %s2190_s6 = inlined_call_operand.vmem [shape: f32[2,4,256], index: 6, kind: output, shape index: {}]  }
   0x1 LB: > { %s1428_s22 = sadd.s32 4294967295, %s1575_s21   ;;  %p1432_p0 = scmp.ge.s32.totalorder %s1575_s21, 1  ;;  %s1575_s21 = sphi %s1657_s21, %s16_s21  }
   0x2   : > { %p212_p1 = scmp.lt.s32.totalorder %s1575_s21, 3 }
   0x4   : > { %p213_p2 = pnand %p1432_p0, %p212_p1 }
   0x5   : > { %p242_p3 = scmp.lt.s32.totalorder (!%p213_p2), %s1428_s22, 1  ;;  %s1582_s29 = smov (!%p213_p2), 17  }
   0x6   : > { %216 = sbr.rel (%p213_p2) target bundleno = 554 (0x22a), region = 44  ;;  %s1585_s8 = smov (!%p213_p2), 16  }
   0x7   : > { %s1587_s9 = smov (!%p213_p2), 15   ;;  %s1591_s12 = smov (!%p213_p2), 1  }
   0x8   : > { %s1602_s17 = smov (!%p213_p2), 127   ;;  %s1607_s24 = smov (!%p213_p2), 113  }
   0x9   : > { %s1612_s26 = smov (!%p213_p2), 111   ;;  %s1614_s10 = smov (!%p213_p2), 112  }
   0xb   : > { %v276_v0 = vld [vmem:[%s2186_s2] sm:$0xf]  ;;  %v1577_v1 = vmov 0   ;;  %s2213_s22 = smov (!%p242_p3, %s1428_s22), 1  ;;  %v1578_v2 = vmov 2   ;;  %v1579_v3 = vmov 5  }
   0xc   : > { %1495 = vset.pattern.permute.xlu1 %v1577_v1  ;;  %1497 = vset.pattern.permute.xlu2 %v1578_v2  ;;  %s1440_s25 = sshll.u32 %s2213_s22, 3  ;;  %v1580_v5 = vmov 1   ;;  %v1581_v6 = vmov 3   ;;  %v1583_v9 = vmov 6   ;;  %v328_v10 = vld [vmem:[%s2186_s2] sm:$0xf] }
   0xd   : > { %279 = vperm.xlu1 %1495, %v276_v0   ;;  %297 = vperm.xlu2 %1497, %v276_v0   ;;  %s246_s28 = scalar_lea.vmem %s2184_s0, %s1440_s25  ;;  %v1584_v11 = vmov 4   ;;  %v1586_v14 = vmov 7   ;;  %v1588_v17 = vmov 9   ;;  %v1589_v18 = vmov 10   ;;  %v389_v21 = vld [vmem:[%s2186_s2] sm:$0xf] }
   0xe   : > { %1500 = vset.pattern.permute.xlu0 %v1579_v3  ;;  %v1679_v4 = vld [vmem:[%s246_s28] sm:$0xff]  ;;  %v1590_v22 = vmov 8   ;;  %v1592_v23 = vmov 11   ;;  %v1593_v24 = vmov 13   ;;  %v1594_v25 = vmov 14  }
   0xf   : > { %257 = vst [vmem:[#allocation1] ss:$2 sm:$0xff] %v1679_v4  ;;  %v445_v26 = vld [vmem:[%s2186_s2] sm:$0xf]  ;;  %v1595_v27 = vmov 12   ;;  %v1596_v28 = vmov 16  }
  0x10   : > { %v1597_v29 = vmov 19   ;;  %v1598_v30 = vmov 15   ;;  %v557_v33 = vld [vmem:[%s2186_s2] sm:$0xf]  ;;  %v1599_v34 = vmov 18   ;;  %v1600_v35 = vmov 22  }
  0x11   : > { %v1601_v36 = vmov 17   ;;  %v613_v37 = vld [vmem:[%s2186_s2] sm:$0xf]  ;;  %v1603_v38 = vmov 21   ;;  %v1604_v39 = vmov 25   ;;  %v1605_v42 = vmov 20  }
  0x12   : > { %v1739_v44 = vld [vmem:[%s2186_s2] sm:$0xf]  ;;  %v1606_v45 = vmov 28   ;;  %v2197_v47 = vmov 24   ;;  %v1609_v48 = vmov 23   ;;  %v2200_v53 = vmov 26  }
  0x13   : > { %v2193_v55 = vmov 27   ;;  %v253_v56 = vld [vmem:[%s2185_s1] ss:$2 sm:$0x3]  ;;  %vm264_vm0 = vcmask 138240   ;;  %v2191_v61 = vmov 34  }
  0x14   : > { %v1760_v59 = vperm.slane %v253_v56, 0  ;;  %v1765_v60 = vld [vmem:[%s2186_s2] sm:$0xf]  ;;  %vm323_vm1 = vcmask 130048   ;;  %vm377_vm2 = vcmask 121856   ;;  %vm438_vm3 = vcmask 7168  }
  0x15   : > { %1496 = vset.pattern.permute.xlu1 %v1580_v5  ;;  %1498 = vset.pattern.permute.xlu2 %v1581_v6  ;;  %vm550_vm4 = vcmask 1039360   ;;  %vm606_vm5 = vcmask 924672   ;;  %vm662_vm6 = vcmask 916480   ;;  %vm716_vm7 = vcmask 908288  }
  0x16   : > { %287 = vperm.xlu1 %1496, %v276_v0   ;;  %307 = vperm.xlu2 %1498, %v276_v0   ;;  %v258_v7 = vld.sshfl [vmem:[#allocation1] sm:$0xff pattern:$0x75316420]  ;;  %v259_v8 = vld.sshfl [vmem:[#allocation1 + $0x8] sm:$0xff pattern:$0x75316420] }
  0x17   : > { %260 = vrot.lane.b32.xlu0 %v258_v7, %s1582_s29  ;;  %316 = vst [vmem:[#allocation1] ss:$2 sm:$0xff] %v1679_v4  ;;  %v2192_v0 = vmov 30   ;;  %vm811_vm8 = vcmask 1043456  }
  0x1e   : > { %1501 = vset.pattern.permute.xlu1 %v1583_v9  ;;  %1499 = vset.pattern.permute.xlu2 %v1584_v11  ;;  %v318_v12 = vld.sshfl [vmem:[#allocation1 + $0x8] sm:$0xff pattern:$0x75316420]  ;;  %v317_v13 = vld.sshfl [vmem:[#allocation1] sm:$0xff pattern:$0x75316420] }
  0x1f   : > { %331 = vperm.xlu2 %1499, %v328_v10   ;;  %262 = vrot.lane.b32.xlu0 %v259_v8, %s1582_s29  ;;  %370 = vst [vmem:[#allocation1] ss:$2 sm:$0xff] %v1679_v4 }
  0x20   : > { %321 = vrot.lane.b32.xlu1 %v318_v12, %s1585_s8 }
  0x26   : > { %v371_v15 = vld.sshfl [vmem:[#allocation1] sm:$0xff pattern:$0x75316420]  ;;  %v372_v16 = vld.sshfl [vmem:[#allocation1 + $0x8] sm:$0xff pattern:$0x75316420] }
  0x27   : > { %1502 = vset.pattern.permute.xlu2 %v1586_v14  ;;  %319 = vrot.lane.b32.xlu0 %v317_v13, %s1585_s8  ;;  %431 = vst [vmem:[#allocation1] ss:$2 sm:$0xff] %v1679_v4  ;;  %v2196_v13 = vmov 29  }
  0x28   : > { %361 = vperm.xlu2 %1502, %v328_v10   ;;  %351 = vperm.xlu1 %1501, %v328_v10  }
  0x2e   : > { %v433_v19 = vld.sshfl [vmem:[#allocation1 + $0x8] sm:$0xff pattern:$0x75316420]  ;;  %v432_v20 = vld.sshfl [vmem:[#allocation1] sm:$0xff pattern:$0x75316420] }
  0x2f   : > { %341 = vperm.xlu0 %1500, %v328_v10   ;;  %543 = vst [vmem:[#allocation1] ss:$2 sm:$0xff] %v1679_v4 }
  0x30   : > { %375 = vrot.lane.b32.xlu2 %v372_v16, %s1587_s9  ;;  %373 = vrot.lane.b32.xlu1 %v371_v15, %s1587_s9 }
  0x31   : > { %1504 = vset.pattern.permute.xlu1 %v1588_v17  ;;  %1505 = vset.pattern.permute.xlu2 %v1589_v18 }
  0x36   : > { %v544_v31 = vld.sshfl [vmem:[#allocation1] sm:$0xff pattern:$0x75316420]  ;;  %v545_v32 = vld.sshfl [vmem:[#allocation1 + $0x8] sm:$0xff pattern:$0x75316420] }
  0x37   : > { %1503 = vset.pattern.permute.xlu0 %v1590_v22  ;;  %599 = vst [vmem:[#allocation1] ss:$2 sm:$0xff] %v1679_v4 }
  0x38   : > { %412 = vperm.xlu2 %1505, %v389_v21   ;;  %402 = vperm.xlu1 %1504, %v389_v21  }
  0x39   : > { %392 = vperm.xlu0 %1503, %v389_v21  }
  0x3e   : > { %v601_v40 = vld.sshfl [vmem:[#allocation1 + $0x8] sm:$0xff pattern:$0x75316420]  ;;  %v600_v41 = vld.sshfl [vmem:[#allocation1] sm:$0xff pattern:$0x75316420] }
  0x3f   : > { %655 = vst [vmem:[#allocation1] ss:$2 sm:$0xff] %v1679_v4 }
  0x40   : > { %434 = vrot.lane.b32.xlu2 %v432_v20, %s1591_s12  ;;  %1506 = vset.pattern.permute.xlu1 %v1592_v23  ;;  %v1777_v20 = vperm.slane %v253_v56, 1 }
  0x41   : > { %1508 = vset.pattern.permute.xlu2 %v1593_v24  ;;  %422 = vperm.xlu1 %1506, %v389_v21  }
  0x42   : > { %436 = vrot.lane.b32.xlu0 %v433_v19, %s1591_s12 }
  0x43   : > { %1509 = vset.pattern.permute.xlu0 %v1594_v25 }
  0x46   : > { %v656_v49 = vld.sshfl [vmem:[#allocation1] sm:$0xff pattern:$0x75316420]  ;;  %v657_v50 = vld.sshfl [vmem:[#allocation1 + $0x8] sm:$0xff pattern:$0x75316420] }
  0x47   : > { %709 = vst [vmem:[#allocation1] ss:$2 sm:$0xff] %v1679_v4 }
  0x48   : > { %458 = vperm.xlu2 %1508, %v445_v26  }
  0x49   : > { %1507 = vset.pattern.permute.xlu1 %v1595_v27 }
  0x4a   : > { %468 = vperm.xlu0 %1509, %v445_v26   ;;  %448 = vperm.xlu1 %1507, %v445_v26  }
  0x4e   : > { %v711_v54 = vld.sshfl [vmem:[#allocation1 + $0x8] sm:$0xff pattern:$0x75316420] }
  0x50   : > { %1511 = vset.pattern.permute.xlu2 %v1596_v28 }
  0x51   : > { %488 = vperm.xlu2 %1511, %v445_v26  }
  0x52   : > { %1514 = vset.pattern.permute.xlu0 %v1597_v29  ;;  %1510 = vset.pattern.permute.xlu1 %v1598_v30 }
  0x53   : > { %530 = vperm.xlu0 %1514, %v445_v26   ;;  %478 = vperm.xlu1 %1510, %v445_v26  }
  0x59   : > { %1513 = vset.pattern.permute.xlu2 %v1599_v34 }
  0x5a   : > { %516 = vperm.xlu2 %1513, %v445_v26  }
  0x5b   : > { %1517 = vset.pattern.permute.xlu0 %v1600_v35  ;;  %1512 = vset.pattern.permute.xlu1 %v1601_v36 }
  0x5c   : > { %580 = vperm.xlu0 %1517, %v557_v33   ;;  %502 = vperm.xlu1 %1512, %v445_v26  }
  0x62   : > { %548 = vrot.lane.b32.xlu2 %v545_v32, %s1602_s17 }
  0x63   : > { %1516 = vset.pattern.permute.xlu2 %v1603_v38 }
  0x64   : > { %1520 = vset.pattern.permute.xlu0 %v1604_v39  ;;  %546 = vrot.lane.b32.xlu1 %v544_v31, %s1602_s17 }
  0x65   : > { %626 = vperm.xlu0 %1520, %v613_v37   ;;  %1515 = vset.pattern.permute.xlu1 %v1605_v42 }
  0x67   : > { %v1734_v43 = vpop.permute.xlu2 %297 }
  0x6a   : > { %570 = vperm.xlu2 %1516, %v557_v33  }
  0x6c   : > { %560 = vperm.xlu1 %1515, %v557_v33  }
  0x6d   : > { %1523 = vset.pattern.permute.xlu0 %v1606_v45 }
  0x6e   : > { %670 = vperm.xlu0 %1523, %v1739_v44  }
  0x70   : > { %v1744_v46 = vpop.permute.xlu2 %307 }
  0x72   : > { %602 = vrot.lane.b32.xlu2 %v600_v41, %s1607_s24 }
  0x73   : > { %1519 = vset.pattern.permute.xlu2 %v2197_v47 }
  0x74   : > { %1518 = vset.pattern.permute.xlu1 %v1609_v48 }
  0x75   : > { %590 = vperm.xlu1 %1518, %v557_v33  }
  0x76   : > { %714 = vrot.lane.b32.xlu0 %v711_v54, %s1612_s26 }
  0x77   : > { %1529 = vset.pattern.permute.xlu0 %v2191_v61 }
  0x79   : > { %v1749_v51 = vpop.permute.xlu2 %331 }
  0x7a   : > { %616 = vperm.xlu2 %1519, %v613_v37  }
  0x7d   : > { %604 = vrot.lane.b32.xlu1 %v601_v40, %s1607_s24 }
  0x7e   : > { %1521 = vset.pattern.permute.xlu1 %v2200_v53  ;;  %746 = vperm.xlu0 %1529, %v1765_v60  }
  0x7f   : > { %v280_v52 = vpop.permute.xlu1 %279 }
  0x82   : > { %1522 = vset.pattern.permute.xlu2 %v2193_v55  ;;  %v1758_v57 = vpop.permute.xlu2 %361 }
  0x83   : > { %646 = vperm.xlu2 %1522, %v613_v37  }
  0x85   : > { %636 = vperm.xlu1 %1521, %v613_v37  }
  0x86   : > { %1534 = vset.pattern.permute.xlu0 %v1578_v2 }
  0x88   : > { %v288_v58 = vpop.permute.xlu1 %287 }
  0x89   : > { %v261_v62 = vpop.permute.xlu0 %260 }
  0x8a   : > { %v268_v63 = vsel %vm264_vm0, 0.0, %v261_v62  ;;  %v1775_v15 = vpop.permute.xlu2 %375 }
  0x8b   : > { %660 = vrot.lane.b32.xlu2 %v657_v50, %s1614_s10  ;;  %v274_v7 = vmul.f32 %v1760_v59, %v268_v63 }
  0x8c   : > { %1525 = vset.pattern.permute.xlu2 %v2192_v0 }
  0x8d   : > { %658 = vrot.lane.b32.xlu1 %v656_v49, %s1614_s10  ;;  %v282_v8 = vperm.slane %v274_v7, 0  ;;  %v290_v10 = vperm.slane %v274_v7, 1  ;;  %v300_v12 = vperm.slane %v274_v7, 2  ;;  %v310_v21 = vperm.slane %v274_v7, 3 }
  0x8e   : > { %1524 = vset.pattern.permute.xlu1 %v2196_v13  ;;  %v710_v7 = vld.sshfl [vmem:[#allocation1] sm:$0xff pattern:$0x75316420] }
  0x8f   : > { %v284_v16 = vmul.f32 %v282_v8, %v280_v52  ;;  %v292_v19 = vmul.f32 %v290_v10, %v288_v58  ;;  %v302_v33 = vmul.f32 %v300_v12, %v1734_v43  ;;  %v312_v49 = vmul.f32 %v310_v21, %v1744_v46 }
  0x91   : > { %v263_v26 = vpop.permute.xlu0 %262  ;;  %v294_v32 = vadd.f32 %v292_v19, %v284_v16 }
  0x92   : > { %v322_v31 = vpop.permute.xlu1 %321  ;;  %v265_v37 = vsel %vm264_vm0, %v261_v62, %v263_v26  ;;  %v1786_v16 = vpop.permute.xlu2 %412 }
  0x93   : > { %690 = vperm.xlu2 %1525, %v1739_v44   ;;  %v275_v40 = vmul.f32 %v1777_v20, %v265_v37  ;;  %v304_v41 = vadd.f32 %v302_v33, %v294_v32 }
  0x95   : > { %680 = vperm.xlu1 %1524, %v1739_v44   ;;  %v283_v50 = vperm.slane %v275_v40, 0  ;;  %v291_v54 = vperm.slane %v275_v40, 1  ;;  %v301_v56 = vperm.slane %v275_v40, 2  ;;  %v314_v63 = vadd.f32 %v312_v49, %v304_v41 }
  0x96   : > { %v311_v12 = vperm.slane %v275_v40, 3 }
  0x97   : > { %v285_v8 = vmul.f32 %v283_v50, %v280_v52  ;;  %v293_v10 = vmul.f32 %v291_v54, %v288_v58  ;;  %v303_v32 = vmul.f32 %v301_v56, %v1734_v43  ;;  %v2201_v58 = vmov 31  }
  0x98   : > { %v313_v49 = vmul.f32 %v311_v12, %v1744_v46 }
  0x99   : > { %v320_v62 = vpop.permute.xlu0 %319  ;;  %v295_v19 = vadd.f32 %v293_v10, %v285_v8 }
  0x9a   : > { %v352_v2 = vpop.permute.xlu1 %351  ;;  %v324_v26 = vsel %vm323_vm1, %v320_v62, %v322_v31  ;;  %v327_v21 = vsel %vm323_vm1, 0.0, %v320_v62  ;;  %v435_v0 = vpop.permute.xlu2 %434 }
  0x9b   : > { %712 = vrot.lane.b32.xlu2 %v710_v7, %s1612_s26  ;;  %v334_v33 = vperm.slane %v327_v21, 0  ;;  %v335_v37 = vperm.slane %v324_v26, 0  ;;  %v355_v41 = vperm.slane %v324_v26, 2  ;;  %v365_v52 = vperm.slane %v324_v26, 3 }
  0x9c   : > { %v305_v40 = vadd.f32 %v303_v32, %v295_v19  ;;  %v344_v7 = vperm.slane %v327_v21, 1  ;;  %v354_v10 = vperm.slane %v327_v21, 2  ;;  %v345_v61 = vperm.slane %v324_v26, 1 }
  0x9d   : > { %1526 = vset.pattern.permute.xlu1 %v2201_v58  ;;  %v336_v50 = vmul.f32 %v334_v33, %v1749_v51  ;;  %v337_v31 = vmul.f32 %v335_v37, %v1749_v51  ;;  %v357_v8 = vmul.f32 %v355_v41, %v352_v2  ;;  %v367_v43 = vmul.f32 %v365_v52, %v1758_v57 }
  0x9e   : > { %700 = vperm.xlu1 %1526, %v1739_v44   ;;  %v315_v54 = vadd.f32 %v313_v49, %v305_v40  ;;  %v2195_v32 = vmov 33   ;;  %v364_v44 = vperm.slane %v327_v21, 3  ;;  %v356_v51 = vmul.f32 %v354_v10, %v352_v2 }
  0x9f   : > { %v338_v56 = vadd.f32 %v336_v50, %v314_v63  ;;  %1528 = vset.pattern.permute.xlu2 %v2195_v32  ;;  %v2194_v41 = vmov 32   ;;  %v2198_v2 = vmov 35  }
  0xa0   : > { %v339_v62 = vadd.f32 %v337_v31, %v315_v54  ;;  %v366_v26 = vmul.f32 %v364_v44, %v1758_v57  ;;  %v1437_v54 = vld [vmem:[%s2185_s1 + $0x1] ss:$2 sm:$0x3] }
  0xa1   : > { %v342_v55 = vpop.permute.xlu0 %341 }
  0xa2   : > { %v374_v19 = vpop.permute.xlu1 %373  ;;  %v346_v46 = vmul.f32 %v344_v7, %v342_v55  ;;  %v347_v12 = vmul.f32 %v345_v61, %v342_v55  ;;  %v765_v55 = vld [vmem:[%s2188_s4] sm:$0xf]  ;;  %v1806_v21 = vpop.permute.xlu2 %458 }
  0xa3   : > { %736 = vperm.xlu2 %1528, %v1765_v60  }
  0xa4   : > { %v348_v33 = vadd.f32 %v346_v46, %v338_v56  ;;  %v349_v37 = vadd.f32 %v347_v12, %v339_v62  ;;  %v1824_v56 = vperm.slane %v1437_v54, 0 }
  0xa6   : > { %1527 = vset.pattern.permute.xlu1 %v2194_v41  ;;  %v358_v63 = vadd.f32 %v356_v51, %v348_v33  ;;  %v359_v52 = vadd.f32 %v357_v8, %v349_v37  ;;  %v1820_v8 = vperm.slane %v1437_v54, 1 }
  0xa7   : > { %726 = vperm.xlu1 %1527, %v1765_v60  }
  0xa8   : > { %v368_v40 = vadd.f32 %v366_v26, %v358_v63  ;;  %v369_v49 = vadd.f32 %v367_v43, %v359_v52  ;;  %v442_v63 = vsel %vm438_vm3, 0.0, %v435_v0 }
  0xa9   : > { %v443_v54 = vmul.f32 %v442_v63, %v1760_v59 }
  0xaa   : > { %v403_v61 = vpop.permute.xlu1 %402 }
  0xab   : > { %1531 = vset.pattern.permute.xlu2 %v1577_v1  ;;  %v1812_v57 = vpop.permute.xlu2 %488  ;;  %v393_v43 = vpop.permute.xlu0 %392 }
  0xac   : > { %768 = vperm.xlu2 %1531, %v765_v55  }
  0xaf   : > { %1530 = vset.pattern.permute.xlu1 %v2198_v2 }
  0xb0   : > { %756 = vperm.xlu1 %1530, %v1765_v60   ;;  %v378_v60 = vsel %vm377_vm2, %v374_v19, %v1775_v15 }
  0xb3   : > { %v423_v50 = vpop.permute.xlu1 %422 }
  0xb4   : > { %1533 = vset.pattern.permute.xlu2 %v1580_v5  ;;  %v1818_v7 = vpop.permute.xlu2 %516  ;;  %v381_v5 = vsel %vm377_vm2, 0.0, %v374_v19  ;;  %v437_v12 = vpop.permute.xlu0 %436 }
  0xb5   : > { %v387_v62 = vmul.f32 %v1824_v56, %v381_v5  ;;  %v439_v37 = vsel %vm438_vm3, %v435_v0, %v437_v12  ;;  %v451_v0 = vperm.slane %v443_v54, 0 }
  0xb6   : > { %v444_v55 = vmul.f32 %v439_v37, %v1777_v20 }
  0xb7   : > { %v395_v51 = vperm.slane %v387_v62, 0  ;;  %v405_v5 = vperm.slane %v387_v62, 1  ;;  %v415_v13 = vperm.slane %v387_v62, 2 }
  0xb8   : > { %1532 = vset.pattern.permute.xlu1 %v1577_v1  ;;  %v388_v1 = vmul.f32 %v1820_v8, %v378_v60 }
  0xb9   : > { %v397_v15 = vmul.f32 %v395_v51, %v393_v43  ;;  %v452_v51 = vperm.slane %v444_v55, 0  ;;  %v417_v63 = vmul.f32 %v415_v13, %v1786_v16  ;;  %v492_v13 = vperm.slane %v1679_v4, 4 }
  0xba   : > { %v396_v46 = vperm.slane %v388_v1, 0  ;;  %v406_v19 = vperm.slane %v388_v1, 1  ;;  %v416_v60 = vperm.slane %v388_v1, 2 }
  0xbb   : > { %v399_v32 = vadd.f32 %v397_v15, %v368_v40  ;;  %v462_v40 = vperm.slane %v444_v55, 1 }
  0xbc   : > { %v449_v31 = vpop.permute.xlu1 %448  ;;  %v1831_v44 = vpop.permute.xlu2 %548  ;;  %v398_v33 = vmul.f32 %v396_v46, %v393_v43  ;;  %v408_v41 = vmul.f32 %v406_v19, %v403_v61  ;;  %v407_v46 = vmul.f32 %v405_v5, %v403_v61  ;;  %v426_v43 = vperm.slane %v388_v1, 3 }
  0xbd   : > { %v418_v2 = vmul.f32 %v416_v60, %v1786_v16  ;;  %v454_v15 = vmul.f32 %v452_v51, %v449_v31  ;;  %v453_v5 = vmul.f32 %v451_v0, %v449_v31  ;;  %v482_v0 = vperm.slane %v444_v55, 3 }
  0xbe   : > { %v400_v26 = vadd.f32 %v398_v33, %v369_v49  ;;  %v409_v53 = vadd.f32 %v407_v46, %v399_v32  ;;  %v425_v49 = vperm.slane %v387_v62, 3  ;;  %v428_v33 = vmul.f32 %v426_v43, %v423_v50  ;;  %v469_v43 = vpop.permute.xlu0 %468 }
  0xbf   : > { %v464_v62 = vmul.f32 %v462_v40, %v1806_v21  ;;  %v472_v46 = vperm.slane %v444_v55, 2 }
  0xc0   : > { %v410_v12 = vadd.f32 %v408_v41, %v400_v26  ;;  %v427_v19 = vmul.f32 %v425_v49, %v423_v50  ;;  %v775_v41 = vld [vmem:[%s2189_s5] sm:$0xf]  ;;  %v419_v61 = vadd.f32 %v417_v63, %v409_v53  ;;  %v461_v26 = vperm.slane %v443_v54, 1 }
  0xc1   : > { %778 = vperm.xlu1 %1532, %v775_v41   ;;  %v491_v53 = vperm.slane %v1679_v4, 0  ;;  %v474_v31 = vmul.f32 %v472_v46, %v469_v43  ;;  %v506_v49 = vperm.slane %v1679_v4, 5  ;;  %v481_v63 = vperm.slane %v443_v54, 3 }
  0xc2   : > { %v420_v58 = vadd.f32 %v418_v2, %v410_v12  ;;  %v429_v32 = vadd.f32 %v427_v19, %v419_v61  ;;  %v463_v2 = vmul.f32 %v461_v26, %v1806_v21  ;;  %v471_v12 = vperm.slane %v443_v54, 2  ;;  %v1860_v19 = vld [vmem:[%s2187_s3] sm:$0xf] }
  0xc3   : > { %v505_v41 = vperm.slane %v1679_v4, 1  ;;  %816 = vperm.xlu2 %1533, %v1860_v19   ;;  %v495_v55 = vperm.slane %v491_v53, 0  ;;  %830 = vperm.xlu0 %1534, %v1860_v19   ;;  %v510_v26 = vperm.slane %v506_v49, 1 }
  0xc4   : > { %v1839_v47 = vpop.permute.xlu2 %570  ;;  %v430_v1 = vadd.f32 %v428_v33, %v420_v58  ;;  %v455_v50 = vadd.f32 %v453_v5, %v429_v32  ;;  %v496_v33 = vperm.slane %v492_v13, 0  ;;  %v473_v21 = vmul.f32 %v471_v12, %v469_v43 }
  0xc5   : > { %v1827_v10 = vpop.permute.xlu1 %478  ;;  %v519_v32 = vperm.slane %v1679_v4, 2  ;;  %v509_v46 = vperm.slane %v505_v41, 1  ;;  %v497_v43 = vmul.f32 %v495_v55, %v1812_v57  ;;  %v554_v13 = vsel %vm550_vm4, %v1831_v44, 0.0 }
  0xc6   : > { %v456_v60 = vadd.f32 %v454_v15, %v430_v1  ;;  %v465_v40 = vadd.f32 %v463_v2, %v455_v50  ;;  %v484_v15 = vmul.f32 %v482_v0, %v1827_v10  ;;  %v483_v54 = vmul.f32 %v481_v63, %v1827_v10  ;;  %v531_v0 = vpop.permute.xlu0 %530 }
  0xc7   : > { %v520_v1 = vperm.slane %v1679_v4, 6  ;;  %v498_v5 = vmul.f32 %v496_v33, %v1812_v57  ;;  %v523_v49 = vperm.slane %v519_v32, 2  ;;  %v556_v63 = vmul.f32 %v554_v13, %v1820_v8 }
  0xc8   : > { %v466_v58 = vadd.f32 %v464_v62, %v456_v60  ;;  %v475_v62 = vadd.f32 %v473_v21, %v465_v40 }
  0xc9   : > { %801 = vperm.xlu1 %1532, %v1860_v19   ;;  %v524_v12 = vperm.slane %v520_v1, 2 }
  0xca   : > { %v476_v61 = vadd.f32 %v474_v31, %v466_v58  ;;  %v485_v10 = vadd.f32 %v483_v54, %v475_v62  ;;  %v534_v58 = vperm.slane %v1679_v4, 7  ;;  %v533_v31 = vperm.slane %v1679_v4, 3 }
  0xcb   : > { %1536 = vset.pattern.permute.xlu2 %v1584_v11  ;;  %v526_v21 = vmul.f32 %v524_v12, %v1818_v7  ;;  %1537 = vset.pattern.permute.xlu0 %v1579_v3  ;;  %v584_v12 = vperm.slane %v556_v63, 2 }
  0xcc   : > { %v1850_v16 = vpop.permute.xlu2 %602  ;;  %v486_v60 = vadd.f32 %v484_v15, %v476_v61  ;;  %866 = vperm.xlu2 %1536, %v1860_v19   ;;  %v499_v15 = vadd.f32 %v497_v43, %v485_v10  ;;  %v538_v55 = vperm.slane %v534_v58, 3  ;;  %880 = vperm.xlu0 %1537, %v1860_v19  }
  0xce   : > { %v1835_v52 = vpop.permute.xlu1 %502  ;;  %v500_v33 = vadd.f32 %v498_v5, %v486_v60  ;;  %v540_v1 = vmul.f32 %v538_v55, %v531_v0 }
  0xcf   : > { %v512_v53 = vmul.f32 %v510_v26, %v1835_v52  ;;  %v511_v57 = vmul.f32 %v509_v46, %v1835_v52  ;;  %v537_v52 = vperm.slane %v533_v31, 3  ;;  %v574_v26 = vperm.slane %v556_v63, 1  ;;  %v581_v46 = vpop.permute.xlu0 %580 }
  0xd1   : > { %1535 = vset.pattern.permute.xlu1 %v1581_v6  ;;  %v514_v41 = vadd.f32 %v512_v53, %v500_v33  ;;  %v525_v6 = vmul.f32 %v523_v49, %v1818_v7  ;;  %v513_v11 = vadd.f32 %v511_v57, %v499_v15  ;;  %v539_v62 = vmul.f32 %v537_v52, %v531_v0 }
  0xd2   : > { %844 = vperm.xlu1 %1535, %v1860_v19   ;;  %v576_v10 = vmul.f32 %v574_v26, %v1839_v47  ;;  %v586_v33 = vmul.f32 %v584_v12, %v581_v46  ;;  %v594_v57 = vperm.slane %v556_v63, 3 }
  0xd3   : > { %v528_v54 = vadd.f32 %v526_v21, %v514_v41  ;;  %v527_v32 = vadd.f32 %v525_v6, %v513_v11 }
  0xd4   : > { %v1876_v50 = vpop.permute.xlu2 %616  ;;  %1539 = vset.pattern.permute.xlu2 %v1586_v14  ;;  %1540 = vset.pattern.permute.xlu0 %v1590_v22 }
  0xd5   : > { %v542_v7 = vadd.f32 %v540_v1, %v528_v54  ;;  %908 = vperm.xlu2 %1539, %v1860_v19   ;;  %v541_v58 = vadd.f32 %v539_v62, %v527_v32 }
  0xd6   : > { %v1842_v37 = vpop.permute.xlu1 %546 }
  0xd7   : > { %v551_v40 = vsel %vm550_vm4, %v1842_v37, %v1831_v44  ;;  %v564_v44 = vperm.slane %v556_v63, 0  ;;  %v627_v55 = vpop.permute.xlu0 %626 }
  0xd8   : > { %v555_v61 = vmul.f32 %v551_v40, %v1824_v56 }
  0xda   : > { %v563_v60 = vperm.slane %v555_v61, 0  ;;  %1538 = vset.pattern.permute.xlu1 %v1583_v9  ;;  %v573_v31 = vperm.slane %v555_v61, 1  ;;  %v583_v21 = vperm.slane %v555_v61, 2  ;;  %v593_v22 = vperm.slane %v555_v61, 3 }
  0xdb   : > { %894 = vperm.xlu1 %1538, %v1860_v19  }
  0xdc   : > { %v575_v40 = vmul.f32 %v573_v31, %v1839_v47 }
  0xdd   : > { %v1895_v5 = vpop.permute.xlu2 %646  ;;  %1542 = vset.pattern.permute.xlu2 %v1589_v18 }
  0xde   : > { %v1853_v51 = vpop.permute.xlu1 %560 }
  0xdf   : > { %v566_v3 = vmul.f32 %v564_v44, %v1853_v51  ;;  %v565_v13 = vmul.f32 %v563_v60, %v1853_v51  ;;  %v585_v44 = vmul.f32 %v583_v21, %v581_v46 }
  0xe1   : > { %v568_v9 = vadd.f32 %v566_v3, %v542_v7  ;;  %v567_v49 = vadd.f32 %v565_v13, %v541_v58  ;;  %v671_v7 = vpop.permute.xlu0 %670 }
  0xe3   : > { %v578_v15 = vadd.f32 %v576_v10, %v568_v9  ;;  %v577_v52 = vadd.f32 %v575_v40, %v567_v49  ;;  %1541 = vset.pattern.permute.xlu1 %v1588_v17 }
  0xe4   : > { %946 = vperm.xlu1 %1541, %v1860_v19  }
  0xe5   : > { %v588_v63 = vadd.f32 %v586_v33, %v578_v15  ;;  %v587_v1 = vadd.f32 %v585_v44, %v577_v52 }
  0xe7   : > { %v1874_v2 = vpop.permute.xlu1 %590 }
  0xe8   : > { %v596_v6 = vmul.f32 %v594_v57, %v1874_v2  ;;  %v595_v47 = vmul.f32 %v593_v22, %v1874_v2 }
  0xe9   : > { %v715_v22 = vpop.permute.xlu0 %714 }
  0xea   : > { %v598_v26 = vadd.f32 %v596_v6, %v588_v63  ;;  %v597_v62 = vadd.f32 %v595_v47, %v587_v1 }
  0xec   : > { %1543 = vset.pattern.permute.xlu1 %v1592_v23 }
  0xef   : > { %v605_v37 = vpop.permute.xlu1 %604 }
  0xf0   : > { %v610_v43 = vsel %vm606_vm5, %v605_v37, 0.0  ;;  %v607_v53 = vsel %vm606_vm5, %v1850_v16, %v605_v37  ;;  %v661_v16 = vpop.permute.xlu2 %660 }
  0xf1   : > { %v612_v14 = vmul.f32 %v610_v43, %v1777_v20  ;;  %v611_v51 = vmul.f32 %v607_v53, %v1760_v59  ;;  %v666_v46 = vsel %vm662_vm6, %v661_v16, 0.0 }
  0xf2   : > { %v674_v57 = vperm.slane %v666_v46, 0  ;;  %v684_v52 = vperm.slane %v666_v46, 1  ;;  %v694_v63 = vperm.slane %v666_v46, 2 }
  0xf3   : > { %v620_v41 = vperm.slane %v612_v14, 0  ;;  %v619_v11 = vperm.slane %v611_v51, 0  ;;  %v630_v32 = vperm.slane %v612_v14, 1  ;;  %v629_v3 = vperm.slane %v611_v51, 1 }
  0xf4   : > { %v640_v43 = vperm.slane %v612_v14, 2  ;;  %v639_v12 = vperm.slane %v611_v51, 2  ;;  %v650_v31 = vperm.slane %v612_v14, 3  ;;  %v649_v33 = vperm.slane %v611_v51, 3 }
  0xf5   : > { %v622_v37 = vmul.f32 %v620_v41, %v1876_v50  ;;  %v621_v61 = vmul.f32 %v619_v11, %v1876_v50  ;;  %v632_v18 = vmul.f32 %v630_v32, %v627_v55  ;;  %v631_v2 = vmul.f32 %v629_v3, %v627_v55 }
  0xf6   : > { %v652_v15 = vmul.f32 %v650_v31, %v1895_v5  ;;  %v651_v23 = vmul.f32 %v649_v33, %v1895_v5  ;;  %v676_v55 = vmul.f32 %v674_v57, %v671_v7 }
  0xf7   : > { %v637_v0 = vpop.permute.xlu1 %636  ;;  %v624_v60 = vadd.f32 %v622_v37, %v598_v26  ;;  %v623_v17 = vadd.f32 %v621_v61, %v597_v62  ;;  %v704_v62 = vperm.slane %v666_v46, 3 }
  0xf8   : > { %v691_v13 = vpop.permute.xlu2 %690  ;;  %v642_v53 = vmul.f32 %v640_v43, %v637_v0  ;;  %v641_v49 = vmul.f32 %v639_v12, %v637_v0  ;;  %v720_v0 = vsel %vm716_vm7, %v715_v22, 0.0 }
  0xf9   : > { %v634_v10 = vadd.f32 %v632_v18, %v624_v60  ;;  %v633_v9 = vadd.f32 %v631_v2, %v623_v17  ;;  %v722_v32 = vmul.f32 %v720_v0, %v1820_v8  ;;  %v696_v60 = vmul.f32 %v694_v63, %v691_v13 }
  0xfb   : > { %v644_v40 = vadd.f32 %v642_v53, %v634_v10  ;;  %v643_v41 = vadd.f32 %v641_v49, %v633_v9  ;;  %v730_v12 = vperm.slane %v722_v32, 0  ;;  %v750_v46 = vperm.slane %v722_v32, 2 }
  0xfd   : > { %v654_v11 = vadd.f32 %v652_v15, %v644_v40  ;;  %v653_v51 = vadd.f32 %v651_v23, %v643_v41 }
  0xff   : > { %v659_v54 = vpop.permute.xlu1 %658  ;;  %v678_v26 = vadd.f32 %v676_v55, %v654_v11 }
 0x100   : > { %v663_v50 = vsel %vm662_vm6, %v659_v54, %v661_v16  ;;  %v713_v6 = vpop.permute.xlu2 %712 }
 0x101   : > { %v673_v21 = vperm.slane %v663_v50, 0  ;;  %v683_v44 = vperm.slane %v663_v50, 1  ;;  %v717_v14 = vsel %vm716_vm7, %v713_v6, %v715_v22  ;;  %v693_v61 = vperm.slane %v663_v50, 2 }
 0x102   : > { %v721_v1 = vmul.f32 %v717_v14, %v1824_v56  ;;  %v703_v18 = vperm.slane %v663_v50, 3  ;;  %v760_v14 = vperm.slane %v722_v32, 3 }
 0x103   : > { %v675_v16 = vmul.f32 %v673_v21, %v671_v7  ;;  %v695_v7 = vmul.f32 %v693_v61, %v691_v13  ;;  %v747_v13 = vpop.permute.xlu0 %746 }
 0x104   : > { %v729_v43 = vperm.slane %v721_v1, 0  ;;  %v739_v53 = vperm.slane %v721_v1, 1  ;;  %v749_v55 = vperm.slane %v721_v1, 2  ;;  %v752_v22 = vmul.f32 %v750_v46, %v747_v13 }
 0x105   : > { %v677_v5 = vadd.f32 %v675_v16, %v653_v51 }
 0x106   : > { %v751_v16 = vmul.f32 %v749_v55, %v747_v13 }
 0x107   : > { %v681_v58 = vpop.permute.xlu1 %680 }
 0x108   : > { %v685_v47 = vmul.f32 %v683_v44, %v681_v58  ;;  %v686_v37 = vmul.f32 %v684_v52, %v681_v58  ;;  %v740_v58 = vperm.slane %v722_v32, 1  ;;  %v737_v49 = vpop.permute.xlu2 %736  ;;  %v759_v44 = vperm.slane %v721_v1, 3 }
 0x109   : > { %v741_v41 = vmul.f32 %v739_v53, %v737_v49  ;;  %v2207_v1 = vmov 27  }
 0x10a   : > { %v687_v3 = vadd.f32 %v685_v47, %v677_v5  ;;  %v688_v17 = vadd.f32 %v686_v37, %v678_v26  ;;  %v742_v52 = vmul.f32 %v740_v58, %v737_v49 }
 0x10c   : > { %v697_v31 = vadd.f32 %v695_v7, %v687_v3  ;;  %v698_v9 = vadd.f32 %v696_v60, %v688_v17  ;;  %v2208_v7 = vmov 30  }
 0x110   : > { %v701_v54 = vpop.permute.xlu1 %700 }
 0x111   : > { %v705_v2 = vmul.f32 %v703_v18, %v701_v54  ;;  %v706_v10 = vmul.f32 %v704_v62, %v701_v54  ;;  %v769_v54 = vpop.permute.xlu2 %768 }
 0x113   : > { %v707_v57 = vadd.f32 %v705_v2, %v697_v31  ;;  %v708_v40 = vadd.f32 %v706_v10, %v698_v9  ;;  %v2209_v2 = vmov 33   ;;  %v1621_v10 = vmov 839922192  }
 0x119   : > { %v727_v33 = vpop.permute.xlu1 %726 }
 0x11a   : > { %v731_v21 = vmul.f32 %v729_v43, %v727_v33  ;;  %v732_v15 = vmul.f32 %v730_v12, %v727_v33  ;;  %v781_v12 = vunpack.c.l.s4 %v1621_v10  ;;  %v2211_v10 = vmov 34  }
 0x11c   : > { %v733_v23 = vadd.f32 %v731_v21, %v707_v57  ;;  %v734_v50 = vadd.f32 %v732_v15, %v708_v40  ;;  %v782_v58 = vunpack.c.0.s8 %v781_v12 }
 0x11e   : > { %v743_v6 = vadd.f32 %v741_v41, %v733_v23  ;;  %v744_v11 = vadd.f32 %v742_v52, %v734_v50  ;;  %v2210_v41 = vmov 32  }
 0x120   : > { %v753_v47 = vadd.f32 %v751_v16, %v743_v6  ;;  %v754_v37 = vadd.f32 %v752_v22, %v744_v11 }
 0x122   : > { %v757_v0 = vpop.permute.xlu1 %756 }
 0x123   : > { %v761_v51 = vmul.f32 %v759_v44, %v757_v0  ;;  %v762_v63 = vmul.f32 %v760_v14, %v757_v0 }
 0x125   : > { %v763_v26 = vadd.f32 %v761_v51, %v753_v47  ;;  %v764_v61 = vadd.f32 %v762_v63, %v754_v37 }
 0x127   : > { %v771_v5 = vadd.f32 %v769_v54, %v763_v26  ;;  %v772_v62 = vadd.f32 %v769_v54, %v764_v61 }
 0x129   : > { %v1927_v60 = vmax.f32 %v771_v5, 0.0  ;;  %v1929_v3 = vmax.f32 %v772_v62, 0.0 }
 0x12b   : > { %859 = vrot.lane.b32.xlu1 %v1929_v3, %s1585_s8  ;;  %790 = vrot.lane.b32.xlu0 %v1929_v3, %s1582_s29 }
 0x12c   : > { %788 = vrot.lane.b32.xlu2 %v1927_v60, %s1582_s29 }
 0x133   : > { %932 = vperm.xlu0 %1540, %v1860_v19   ;;  %921 = vrot.lane.b32.xlu1 %v1927_v60, %s1587_s9 }
 0x134   : > { %960 = vperm.xlu2 %1542, %v1860_v19  }
 0x13b   : > { %989 = vrot.lane.b32.xlu0 %v1929_v3, %s1591_s12  ;;  %974 = vperm.xlu1 %1543, %v1860_v19  }
 0x13c   : > { %857 = vrot.lane.b32.xlu2 %v1927_v60, %s1585_s8  ;;  %1546 = vset.pattern.permute.xlu0 %v1594_v25  ;;  %v779_v25 = vpop.permute.xlu1 %778 }
 0x13d   : > { %1545 = vset.pattern.permute.xlu2 %v1593_v24  ;;  %v1976_v24 = vpop.permute.xlu2 %816  ;;  %v783_v21 = vperm.slane %v779_v25, %v782_v58 }
 0x13f   : > { %v785_v44 = vadd.f32 %v783_v21, %v1679_v4 }
 0x143   : > { %1026 = vperm.xlu0 %1546, %v1860_v19   ;;  %1544 = vset.pattern.permute.xlu1 %v1595_v27  ;;  %v2202_v27 = vmov 31  }
 0x144   : > { %923 = vrot.lane.b32.xlu2 %v1929_v3, %s1587_s9  ;;  %998 = vperm.xlu1 %1544, %v1860_v19   ;;  %s251_s9 = scalar_lea.vmem %s2190_s6, %s1440_s25 }
 0x14b   : > { %1551 = vset.pattern.permute.xlu0 %v1597_v29  ;;  %v802_v29 = vpop.permute.xlu1 %801 }
 0x14c   : > { %987 = vrot.lane.b32.xlu2 %v1927_v60, %s1591_s12  ;;  %1096 = vperm.xlu0 %1551, %v1860_v19  }
 0x14d   : > { %1547 = vset.pattern.permute.xlu1 %v1598_v30  ;;  %v2203_v30 = vmov 26  }
 0x14e   : > { %1040 = vperm.xlu1 %1547, %v1860_v19  }
 0x154   : > { %1012 = vperm.xlu2 %1545, %v1860_v19   ;;  %1554 = vset.pattern.permute.xlu0 %v1600_v35 }
 0x155   : > { %1148 = vperm.xlu0 %1554, %v1860_v19  }
 0x156   : > { %1549 = vset.pattern.permute.xlu1 %v1601_v36  ;;  %v1996_v36 = vpop.permute.xlu1 %844 }
 0x157   : > { %1068 = vperm.xlu1 %1549, %v1860_v19  }
 0x15c   : > { %1548 = vset.pattern.permute.xlu2 %v1596_v28  ;;  %v1985_v28 = vpop.permute.xlu2 %866 }
 0x15d   : > { %1054 = vperm.xlu2 %1548, %v1860_v19   ;;  %1557 = vset.pattern.permute.xlu0 %v1604_v39 }
 0x15e   : > { %1200 = vperm.xlu0 %1557, %v1860_v19  }
 0x15f   : > { %1109 = vrot.lane.b32.xlu1 %v1927_v60, %s1602_s17 }
 0x160   : > { %1552 = vset.pattern.permute.xlu1 %v1605_v42  ;;  %v2003_v42 = vpop.permute.xlu1 %894 }
 0x164   : > { %v1992_v35 = vpop.permute.xlu2 %908 }
 0x165   : > { %1550 = vset.pattern.permute.xlu2 %v1599_v34  ;;  %v2204_v34 = vmov 35  }
 0x166   : > { %1082 = vperm.xlu2 %1550, %v1860_v19   ;;  %1560 = vset.pattern.permute.xlu0 %v1606_v45  ;;  %v2206_v45 = vmov 29  }
 0x167   : > { %1120 = vperm.xlu1 %1552, %v1860_v19   ;;  %1250 = vperm.xlu0 %1560, %v1860_v19  }
 0x168   : > { %v2011_v17 = vpop.permute.xlu1 %946 }
 0x16e   : > { %1111 = vrot.lane.b32.xlu2 %v1929_v3, %s1602_s17 }
 0x16f   : > { %1555 = vset.pattern.permute.xlu1 %v1609_v48  ;;  %1553 = vset.pattern.permute.xlu2 %v1603_v38  ;;  %v2205_v38 = vmov 24   ;;  %v831_v48 = vpop.permute.xlu0 %830 }
 0x170   : > { %1162 = vperm.xlu1 %1555, %v1860_v19   ;;  %1563 = vset.pattern.permute.xlu0 %v2202_v27 }
 0x171   : > { %1292 = vperm.xlu0 %1563, %v1860_v19  }
 0x176   : > { %1134 = vperm.xlu2 %1553, %v1860_v19  }
 0x177   : > { %v2013_v18 = vpop.permute.xlu0 %880 }
 0x178   : > { %1177 = vrot.lane.b32.xlu1 %v1929_v3, %s1607_s24 }
 0x179   : > { %1558 = vset.pattern.permute.xlu1 %v2203_v30  ;;  %1568 = vset.pattern.permute.xlu0 %v2204_v34 }
 0x17e   : > { %1175 = vrot.lane.b32.xlu2 %v1927_v60, %s1607_s24 }
 0x17f   : > { %1556 = vset.pattern.permute.xlu2 %v2205_v38 }
 0x180   : > { %1214 = vperm.xlu1 %1558, %v1860_v19  }
 0x186   : > { %1186 = vperm.xlu2 %1556, %v1860_v19   ;;  %v789_v39 = vpop.permute.xlu2 %788 }
 0x187   : > { %v795_v53 = vsel %vm264_vm0, 0.0, %v789_v39 }
 0x188   : > { %1243 = vrot.lane.b32.xlu1 %v1929_v3, %s1614_s10  ;;  %v796_v31 = vmul.f32 %v795_v53, %v1760_v59 }
 0x189   : > { %1561 = vset.pattern.permute.xlu1 %v2206_v45 }
 0x18a   : > { %v804_v15 = vperm.slane %v796_v31, 0  ;;  %v819_v13 = vperm.slane %v796_v31, 1  ;;  %v833_v0 = vperm.slane %v796_v31, 2  ;;  %v847_v62 = vperm.slane %v796_v31, 3 }
 0x18c   : > { %v806_v14 = vmul.f32 %v804_v15, %v802_v29  ;;  %v821_v5 = vmul.f32 %v819_v13, %v1976_v24  ;;  %v849_v12 = vmul.f32 %v847_v62, %v1996_v36 }
 0x18e   : > { %1559 = vset.pattern.permute.xlu2 %v2207_v1  ;;  %v2007_v32 = vpop.permute.xlu2 %960 }
 0x18f   : > { %1228 = vperm.xlu2 %1559, %v1860_v19  }
 0x190   : > { %1264 = vperm.xlu1 %1561, %v1860_v19  }
 0x196   : > { %v858_v43 = vpop.permute.xlu2 %857 }
 0x197   : > { %1241 = vrot.lane.b32.xlu2 %v1927_v60, %s1614_s10  ;;  %v864_v51 = vsel %vm323_vm1, 0.0, %v858_v43 }
 0x198   : > { %1562 = vset.pattern.permute.xlu1 %v2208_v7  ;;  %1565 = vset.pattern.permute.xlu2 %v2209_v2  ;;  %v869_v38 = vperm.slane %v864_v51, 0  ;;  %v883_v53 = vperm.slane %v864_v51, 1  ;;  %v911_v13 = vperm.slane %v864_v51, 3 }
 0x199   : > { %1278 = vperm.xlu1 %1562, %v1860_v19  }
 0x19d   : > { %v860_v9 = vpop.permute.xlu1 %859  ;;  %v791_v49 = vpop.permute.xlu0 %790 }
 0x19e   : > { %v792_v33 = vsel %vm264_vm0, %v789_v39, %v791_v49  ;;  %v924_v57 = vpop.permute.xlu2 %923  ;;  %v861_v46 = vsel %vm323_vm1, %v858_v43, %v860_v9 }
 0x19f   : > { %1307 = vrot.lane.b32.xlu2 %v1929_v3, %s1612_s26  ;;  %v797_v40 = vmul.f32 %v792_v33, %v1777_v20  ;;  %v870_v22 = vperm.slane %v861_v46, 0  ;;  %v884_v47 = vperm.slane %v861_v46, 1  ;;  %v898_v27 = vperm.slane %v861_v46, 2 }
 0x1a0   : > { %v912_v39 = vperm.slane %v861_v46, 3 }
 0x1a1   : > { %1564 = vset.pattern.permute.xlu1 %v2210_v41  ;;  %v805_v52 = vperm.slane %v797_v40, 0  ;;  %v820_v23 = vperm.slane %v797_v40, 1  ;;  %v834_v50 = vperm.slane %v797_v40, 2  ;;  %v848_v55 = vperm.slane %v797_v40, 3 }
 0x1a2   : > { %1316 = vperm.xlu1 %1564, %v1860_v19   ;;  %v872_v4 = vmul.f32 %v870_v22, %v1985_v28  ;;  %v886_v43 = vmul.f32 %v884_v47, %v2013_v18  ;;  %v900_v49 = vmul.f32 %v898_v27, %v2003_v42  ;;  %v897_v40 = vperm.slane %v864_v51, 2 }
 0x1a3   : > { %v807_v6 = vmul.f32 %v805_v52, %v802_v29  ;;  %v822_v11 = vmul.f32 %v820_v23, %v1976_v24  ;;  %v836_v16 = vmul.f32 %v834_v50, %v831_v48  ;;  %v850_v26 = vmul.f32 %v848_v55, %v1996_v36 }
 0x1a4   : > { %v835_v24 = vmul.f32 %v833_v0, %v831_v48  ;;  %v875_v9 = vrot.slane %v872_v4, 4  ;;  %v914_v21 = vmul.f32 %v912_v39, %v1992_v35  ;;  %v889_v46 = vrot.slane %v886_v43, 4 }
 0x1a5   : > { %v922_v63 = vpop.permute.xlu1 %921  ;;  %v810_v37 = vrot.slane %v807_v6, 4  ;;  %v825_v54 = vrot.slane %v822_v11, 4  ;;  %v839_v30 = vrot.slane %v836_v16, 4  ;;  %v853_v2 = vrot.slane %v850_v26, 4 }
 0x1a6   : > { %v2033_v61 = vpop.permute.xlu2 %987  ;;  %v925_v25 = vsel %vm377_vm2, %v922_v63, %v924_v57  ;;  %v928_v31 = vsel %vm377_vm2, 0.0, %v922_v63  ;;  %v871_v57 = vmul.f32 %v869_v38, %v1985_v28  ;;  %v885_v55 = vmul.f32 %v883_v53, %v2013_v18  ;;  %v933_v28 = vpop.permute.xlu0 %932 }
 0x1a7   : > { %1305 = vrot.lane.b32.xlu2 %v1927_v60, %s1612_s26  ;;  %v812_v29 = vsel %vm811_vm8, %v806_v14, %v810_v37  ;;  %v2042_v1 = vmul.f32 %v925_v25, %v1820_v8  ;;  %v826_v7 = vsel %vm811_vm8, %v821_v5, %v825_v54  ;;  %v840_v48 = vsel %vm811_vm8, %v835_v24, %v839_v30 }
 0x1a8   : > { %v814_v45 = vadd.f32 %v812_v29, %v785_v44  ;;  %v854_v41 = vsel %vm811_vm8, %v849_v12, %v853_v2  ;;  %v929_v52 = vmul.f32 %v928_v31, %v1824_v56  ;;  %v876_v6 = vsel %vm811_vm8, %v871_v57, %v875_v9 }
 0x1a9   : > { %v936_v33 = vperm.slane %v2042_v1, 0  ;;  %v950_v23 = vperm.slane %v2042_v1, 1  ;;  %v903_v11 = vrot.slane %v900_v49, 4  ;;  %v964_v44 = vperm.slane %v2042_v1, 2 }
 0x1aa   : > { %1566 = vset.pattern.permute.xlu1 %v2211_v10  ;;  %v828_v58 = vadd.f32 %v826_v7, %v814_v45  ;;  %v899_v14 = vmul.f32 %v897_v40, %v2003_v42  ;;  %v890_v63 = vsel %vm811_vm8, %v885_v55, %v889_v46  ;;  %v917_v47 = vrot.slane %v914_v21, 4 }
 0x1ab   : > { %1344 = vperm.xlu1 %1566, %v1860_v19   ;;  %v938_v16 = vmul.f32 %v936_v33, %v933_v28  ;;  %v935_v37 = vperm.slane %v929_v52, 0  ;;  %v952_v18 = vmul.f32 %v950_v23, %v2011_v17  ;;  %v913_v51 = vmul.f32 %v911_v13, %v1992_v35 }
 0x1ac   : > { %v842_v15 = vadd.f32 %v840_v48, %v828_v58  ;;  %v904_v26 = vsel %vm811_vm8, %v899_v14, %v903_v11  ;;  %v949_v62 = vperm.slane %v929_v52, 1  ;;  %v966_v25 = vmul.f32 %v964_v44, %v2007_v32 }
 0x1ad   : > { %v2055_v36 = vpop.permute.xlu1 %974  ;;  %v941_v5 = vrot.slane %v938_v16, 4  ;;  %v918_v27 = vsel %vm811_vm8, %v913_v51, %v917_v47  ;;  %v937_v42 = vmul.f32 %v935_v37, %v933_v28  ;;  %v955_v29 = vrot.slane %v952_v18, 4 }
 0x1ae   : > { %v2060_v50 = vpop.permute.xlu2 %1012  ;;  %v856_v22 = vadd.f32 %v854_v41, %v842_v15  ;;  %v963_v30 = vperm.slane %v929_v52, 2  ;;  %v951_v35 = vmul.f32 %v949_v62, %v2011_v17  ;;  %v969_v24 = vrot.slane %v966_v25, 4  ;;  %v990_v9 = vpop.permute.xlu0 %989 }
 0x1af   : > { %1330 = vperm.xlu2 %1565, %v1860_v19   ;;  %v942_v43 = vsel %vm811_vm8, %v937_v42, %v941_v5  ;;  %v991_v48 = vsel %vm438_vm3, %v2033_v61, %v990_v9  ;;  %v994_v33 = vsel %vm438_vm3, 0.0, %v2033_v61  ;;  %v977_v41 = vperm.slane %v929_v52, 3 }
 0x1b0   : > { %v878_v0 = vadd.f32 %v876_v6, %v856_v22  ;;  %v965_v2 = vmul.f32 %v963_v30, %v2007_v32  ;;  %v956_v10 = vsel %vm811_vm8, %v951_v35, %v955_v29  ;;  %v978_v32 = vperm.slane %v2042_v1, 3 }
 0x1b1   : > { %v995_v46 = vmul.f32 %v994_v33, %v1760_v59  ;;  %v979_v22 = vmul.f32 %v977_v41, %v2055_v36  ;;  %v1058_v42 = vperm.slane %v1929_v3, 0 }
 0x1b2   : > { %v892_v54 = vadd.f32 %v890_v63, %v878_v0  ;;  %v970_v53 = vsel %vm811_vm8, %v965_v2, %v969_v24  ;;  %v980_v57 = vmul.f32 %v978_v32, %v2055_v36 }
 0x1b3   : > { %v1001_v6 = vperm.slane %v995_v46, 0  ;;  %v1015_v52 = vperm.slane %v995_v46, 1  ;;  %v1029_v62 = vperm.slane %v995_v46, 2  ;;  %v1043_v30 = vperm.slane %v995_v46, 3 }
 0x1b4   : > { %v906_v4 = vadd.f32 %v904_v26, %v892_v54  ;;  %v983_v23 = vrot.slane %v980_v57, 4 }
 0x1b5   : > { %v1017_v54 = vmul.f32 %v1015_v52, %v2060_v50 }
 0x1b6   : > { %v999_v38 = vpop.permute.xlu1 %998  ;;  %v920_v39 = vadd.f32 %v918_v27, %v906_v4  ;;  %v984_v28 = vsel %vm811_vm8, %v979_v22, %v983_v23  ;;  %v1027_v44 = vpop.permute.xlu0 %1026 }
 0x1b7   : > { %1567 = vset.pattern.permute.xlu2 %v2204_v34  ;;  %v2074_v45 = vpop.permute.xlu2 %1054  ;;  %v1003_v63 = vmul.f32 %v1001_v6, %v999_v38  ;;  %v1031_v29 = vmul.f32 %v1029_v62, %v1027_v44 }
 0x1b8   : > { %1358 = vperm.xlu2 %1567, %v1860_v19   ;;  %v944_v7 = vadd.f32 %v942_v43, %v920_v39  ;;  %v996_v19 = vmul.f32 %v991_v48, %v1777_v20  ;;  %v1072_v39 = vperm.slane %v1929_v3, 1 }
 0x1ba   : > { %v958_v12 = vadd.f32 %v956_v10, %v944_v7  ;;  %v1002_v15 = vperm.slane %v996_v19, 0  ;;  %v1016_v55 = vperm.slane %v996_v19, 1  ;;  %v1030_v0 = vperm.slane %v996_v19, 2 }
 0x1bb   : > { %v1044_v36 = vperm.slane %v996_v19, 3  ;;  %v1071_v19 = vperm.slane %v1927_v60, 1 }
 0x1bc   : > { %v972_v58 = vadd.f32 %v970_v53, %v958_v12  ;;  %v1004_v13 = vmul.f32 %v1002_v15, %v999_v38  ;;  %v1018_v1 = vmul.f32 %v1016_v55, %v2060_v50  ;;  %v1032_v37 = vmul.f32 %v1030_v0, %v1027_v44 }
 0x1bd   : > { %v1060_v50 = vmul.f32 %v1058_v42, %v2074_v45  ;;  %v1057_v53 = vperm.slane %v1927_v60, 0  ;;  %v1100_v55 = vperm.slane %v1929_v3, 3 }
 0x1be   : > { %v1007_v61 = vrot.slane %v1004_v13, 4  ;;  %v986_v16 = vadd.f32 %v984_v28, %v972_v58  ;;  %v1021_v47 = vrot.slane %v1018_v1, 4  ;;  %v1035_v25 = vrot.slane %v1032_v37, 4  ;;  %v1097_v15 = vpop.permute.xlu0 %1096 }
 0x1bf   : > { %v1086_v58 = vperm.slane %v1929_v3, 2  ;;  %v1063_v9 = vrot.slane %v1060_v50, 4  ;;  %v1102_v6 = vmul.f32 %v1100_v55, %v1097_v15 }
 0x1c0   : > { %v1041_v31 = vpop.permute.xlu1 %1040  ;;  %v2082_v34 = vpop.permute.xlu2 %1082  ;;  %v1008_v18 = vsel %vm811_vm8, %v1003_v63, %v1007_v61  ;;  %v1022_v5 = vsel %vm811_vm8, %v1017_v54, %v1021_v47  ;;  %v1036_v24 = vsel %vm811_vm8, %v1031_v29, %v1035_v25 }
 0x1c1   : > { %v1010_v51 = vadd.f32 %v1008_v18, %v986_v16  ;;  %v1046_v26 = vmul.f32 %v1044_v36, %v1041_v31  ;;  %v1045_v43 = vmul.f32 %v1043_v30, %v1041_v31  ;;  %v1059_v31 = vmul.f32 %v1057_v53, %v2074_v45 }
 0x1c2   : > { %v1088_v46 = vmul.f32 %v1086_v58, %v2082_v34  ;;  %v1085_v16 = vperm.slane %v1927_v60, 2 }
 0x1c3   : > { %v1024_v27 = vadd.f32 %v1022_v5, %v1010_v51  ;;  %v1049_v38 = vrot.slane %v1046_v26, 4  ;;  %v1064_v22 = vsel %vm811_vm8, %v1059_v31, %v1063_v9 }
 0x1c4   : > { %v1091_v45 = vrot.slane %v1088_v46, 4  ;;  %v1087_v63 = vmul.f32 %v1085_v16, %v2082_v34 }
 0x1c5   : > { %v1038_v2 = vadd.f32 %v1036_v24, %v1024_v27  ;;  %v1050_v12 = vsel %vm811_vm8, %v1045_v43, %v1049_v38 }
 0x1c6   : > { %v1092_v47 = vsel %vm811_vm8, %v1087_v63, %v1091_v45 }
 0x1c7   : > { %v1052_v33 = vadd.f32 %v1050_v12, %v1038_v2  ;;  %v1149_v5 = vpop.permute.xlu0 %1148 }
 0x1c8   : > { %v2084_v49 = vpop.permute.xlu2 %1111 }
 0x1c9   : > { %v1069_v17 = vpop.permute.xlu1 %1068  ;;  %v1116_v10 = vsel %vm550_vm4, %v2084_v49, 0.0  ;;  %v1066_v61 = vadd.f32 %v1064_v22, %v1052_v33 }
 0x1ca   : > { %v1074_v7 = vmul.f32 %v1072_v39, %v1069_v17  ;;  %v1118_v48 = vmul.f32 %v1116_v10, %v1820_v8  ;;  %v1073_v41 = vmul.f32 %v1071_v19, %v1069_v17 }
 0x1cc   : > { %v1077_v32 = vrot.slane %v1074_v7, 4  ;;  %v1124_v1 = vperm.slane %v1118_v48, 0  ;;  %v1138_v62 = vperm.slane %v1118_v48, 1  ;;  %v1166_v38 = vperm.slane %v1118_v48, 3 }
 0x1ce   : > { %v1078_v28 = vsel %vm811_vm8, %v1073_v41, %v1077_v32 }
 0x1cf   : > { %v1080_v0 = vadd.f32 %v1078_v28, %v1066_v61 }
 0x1d0   : > { %v2093_v40 = vpop.permute.xlu2 %1134  ;;  %v1201_v9 = vpop.permute.xlu0 %1200 }
 0x1d1   : > { %v1110_v21 = vpop.permute.xlu1 %1109  ;;  %v1094_v26 = vadd.f32 %v1092_v47, %v1080_v0  ;;  %v1140_v29 = vmul.f32 %v1138_v62, %v2093_v40 }
 0x1d2   : > { %v1113_v13 = vsel %vm550_vm4, %v1110_v21, %v2084_v49  ;;  %v1099_v49 = vperm.slane %v1927_v60, 3  ;;  %v1105_v21 = vrot.slane %v1102_v6, 4  ;;  %v1152_v60 = vperm.slane %v1118_v48, 2 }
 0x1d3   : > { %v1117_v44 = vmul.f32 %v1113_v13, %v1824_v56  ;;  %v1143_v10 = vrot.slane %v1140_v29, 4 }
 0x1d4   : > { %v1101_v54 = vmul.f32 %v1099_v49, %v1097_v15  ;;  %v1154_v7 = vmul.f32 %v1152_v60, %v1149_v5 }
 0x1d5   : > { %v1123_v37 = vperm.slane %v1117_v44, 0  ;;  %v1137_v25 = vperm.slane %v1117_v44, 1  ;;  %v1151_v39 = vperm.slane %v1117_v44, 2  ;;  %v1165_v58 = vperm.slane %v1117_v44, 3 }
 0x1d6   : > { %v1106_v34 = vsel %vm811_vm8, %v1101_v54, %v1105_v21 }
 0x1d7   : > { %v1108_v24 = vadd.f32 %v1106_v34, %v1094_v26  ;;  %v1139_v50 = vmul.f32 %v1137_v25, %v2093_v40  ;;  %v1153_v53 = vmul.f32 %v1151_v39, %v1149_v5  ;;  %v1157_v40 = vrot.slane %v1154_v7, 4 }
 0x1d8   : > { %v2099_v11 = vpop.permute.xlu2 %1175 }
 0x1d9   : > { %v2101_v14 = vpop.permute.xlu1 %1120  ;;  %v1144_v48 = vsel %vm811_vm8, %v1139_v50, %v1143_v10  ;;  %v1158_v41 = vsel %vm811_vm8, %v1153_v53, %v1157_v40  ;;  %v1251_v63 = vpop.permute.xlu0 %1250 }
 0x1da   : > { %v1126_v17 = vmul.f32 %v1124_v1, %v2101_v14  ;;  %v1125_v27 = vmul.f32 %v1123_v37, %v2101_v14 }
 0x1dc   : > { %v1129_v18 = vrot.slane %v1126_v17, 4 }
 0x1de   : > { %v1130_v30 = vsel %vm811_vm8, %v1125_v27, %v1129_v18 }
 0x1df   : > { %v1132_v2 = vadd.f32 %v1130_v30, %v1108_v24 }
 0x1e0   : > { %v2106_v4 = vpop.permute.xlu2 %1186 }
 0x1e1   : > { %v1146_v15 = vadd.f32 %v1144_v48, %v1132_v2 }
 0x1e2   : > { %v2110_v35 = vpop.permute.xlu1 %1162 }
 0x1e3   : > { %v1168_v43 = vmul.f32 %v1166_v38, %v2110_v35  ;;  %v1167_v46 = vmul.f32 %v1165_v58, %v2110_v35  ;;  %v1160_v28 = vadd.f32 %v1158_v41, %v1146_v15  ;;  %v1293_v10 = vpop.permute.xlu0 %1292 }
 0x1e5   : > { %v1171_v32 = vrot.slane %v1168_v43, 4 }
 0x1e9   : > { %v2121_v57 = vpop.permute.xlu2 %1228 }
 0x1ea   : > { %v1178_v23 = vpop.permute.xlu1 %1177 }
 0x1eb   : > { %v1182_v3 = vsel %vm606_vm5, %v1178_v23, 0.0  ;;  %v1179_v42 = vsel %vm606_vm5, %v2099_v11, %v1178_v23  ;;  %v1172_v23 = vsel %vm811_vm8, %v1167_v46, %v1171_v32 }
 0x1ec   : > { %v1184_v36 = vmul.f32 %v1182_v3, %v1777_v20  ;;  %v1183_v14 = vmul.f32 %v1179_v42, %v1760_v59  ;;  %v1174_v44 = vadd.f32 %v1172_v23, %v1160_v28 }
 0x1ee   : > { %v1190_v20 = vperm.slane %v1184_v36, 0  ;;  %v1189_v33 = vperm.slane %v1183_v14, 0  ;;  %v1204_v31 = vperm.slane %v1184_v36, 1  ;;  %v1218_v22 = vperm.slane %v1184_v36, 2 }
 0x1ef   : > { %v1203_v61 = vperm.slane %v1183_v14, 1  ;;  %v1232_v17 = vperm.slane %v1184_v36, 3  ;;  %v1217_v47 = vperm.slane %v1183_v14, 2  ;;  %v1231_v25 = vperm.slane %v1183_v14, 3 }
 0x1f0   : > { %v1192_v12 = vmul.f32 %v1190_v20, %v2106_v4  ;;  %v1191_v55 = vmul.f32 %v1189_v33, %v2106_v4  ;;  %v1206_v13 = vmul.f32 %v1204_v31, %v1201_v9 }
 0x1f1   : > { %v2136_v52 = vpop.permute.xlu2 %1241  ;;  %v1205_v21 = vmul.f32 %v1203_v61, %v1201_v9  ;;  %v1234_v37 = vmul.f32 %v1232_v17, %v2121_v57 }
 0x1f2   : > { %v1215_v51 = vpop.permute.xlu1 %1214  ;;  %v1195_v59 = vrot.slane %v1192_v12, 4  ;;  %v1209_v35 = vrot.slane %v1206_v13, 4 }
 0x1f3   : > { %v1220_v16 = vmul.f32 %v1218_v22, %v1215_v51  ;;  %v1219_v26 = vmul.f32 %v1217_v47, %v1215_v51  ;;  %v1237_v29 = vrot.slane %v1234_v37, 4 }
 0x1f4   : > { %v1196_v6 = vsel %vm811_vm8, %v1191_v55, %v1195_v59  ;;  %v1210_v54 = vsel %vm811_vm8, %v1205_v21, %v1209_v35 }
 0x1f5   : > { %v1198_v3 = vadd.f32 %v1196_v6, %v1174_v44  ;;  %v1223_v4 = vrot.slane %v1220_v16, 4 }
 0x1f7   : > { %v1212_v36 = vadd.f32 %v1210_v54, %v1198_v3  ;;  %v1224_v27 = vsel %vm811_vm8, %v1219_v26, %v1223_v4 }
 0x1f9   : > { %v1308_v19 = vpop.permute.xlu2 %1307  ;;  %v1226_v24 = vadd.f32 %v1224_v27, %v1212_v36 }
 0x1fa   : > { %v1244_v11 = vpop.permute.xlu1 %1243  ;;  %v1312_v38 = vsel %vm716_vm7, %v1308_v19, 0.0 }
 0x1fb   : > { %v1248_v1 = vsel %vm662_vm6, %v1244_v11, 0.0  ;;  %v1245_v18 = vsel %vm662_vm6, %v2136_v52, %v1244_v11  ;;  %v1233_v52 = vmul.f32 %v1231_v25, %v2121_v57  ;;  %v1314_v2 = vmul.f32 %v1312_v38, %v1820_v8 }
 0x1fc   : > { %v1254_v0 = vperm.slane %v1248_v1, 0  ;;  %v1268_v62 = vperm.slane %v1248_v1, 1  ;;  %v1253_v34 = vperm.slane %v1245_v18, 0  ;;  %v1282_v42 = vperm.slane %v1248_v1, 2 }
 0x1fd   : > { %v1296_v51 = vperm.slane %v1248_v1, 3  ;;  %v1267_v43 = vperm.slane %v1245_v18, 1  ;;  %v1238_v14 = vsel %vm811_vm8, %v1233_v52, %v1237_v29  ;;  %v1281_v9 = vperm.slane %v1245_v18, 2 }
 0x1fe   : > { %v1256_v5 = vmul.f32 %v1254_v0, %v1251_v63  ;;  %v1255_v50 = vmul.f32 %v1253_v34, %v1251_v63  ;;  %v1240_v32 = vadd.f32 %v1238_v14, %v1226_v24  ;;  %v1320_v46 = vperm.slane %v1314_v2, 0 }
 0x1ff   : > { %v1298_v57 = vmul.f32 %v1296_v51, %v1293_v10  ;;  %v1295_v59 = vperm.slane %v1245_v18, 3  ;;  %v1334_v13 = vperm.slane %v1314_v2, 1  ;;  %v1362_v44 = vperm.slane %v1314_v2, 3 }
 0x200   : > { %v1259_v20 = vrot.slane %v1256_v5, 4 }
 0x201   : > { %v1306_v49 = vpop.permute.xlu2 %1305  ;;  %v1301_v55 = vrot.slane %v1298_v57, 4  ;;  %v1297_v6 = vmul.f32 %v1295_v59, %v1293_v10 }
 0x202   : > { %v1265_v45 = vpop.permute.xlu1 %1264  ;;  %v1309_v12 = vsel %vm716_vm7, %v1306_v49, %v1308_v19  ;;  %v1260_v53 = vsel %vm811_vm8, %v1255_v50, %v1259_v20  ;;  %v1348_v49 = vperm.slane %v1314_v2, 2 }
 0x203   : > { %v1270_v60 = vmul.f32 %v1268_v62, %v1265_v45  ;;  %v1269_v58 = vmul.f32 %v1267_v43, %v1265_v45  ;;  %v1313_v33 = vmul.f32 %v1309_v12, %v1824_v56  ;;  %v1262_v15 = vadd.f32 %v1260_v53, %v1240_v32 }
 0x204   : > { %v1302_v45 = vsel %vm811_vm8, %v1297_v6, %v1301_v55 }
 0x205   : > { %v1273_v7 = vrot.slane %v1270_v60, 4  ;;  %v1319_v22 = vperm.slane %v1313_v33, 0  ;;  %v1333_v0 = vperm.slane %v1313_v33, 1  ;;  %v1347_v37 = vperm.slane %v1313_v33, 2 }
 0x206   : > { %v1361_v54 = vperm.slane %v1313_v33, 3 }
 0x207   : > { %v1274_v31 = vsel %vm811_vm8, %v1269_v58, %v1273_v7 }
 0x208   : > { %v1276_v19 = vadd.f32 %v1274_v31, %v1262_v15 }
 0x209   : > { %v1331_v11 = vpop.permute.xlu2 %1330 }
 0x20a   : > { %v1336_v61 = vmul.f32 %v1334_v13, %v1331_v11  ;;  %v1335_v4 = vmul.f32 %v1333_v0, %v1331_v11 }
 0x20b   : > { %v1279_v30 = vpop.permute.xlu1 %1278 }
 0x20c   : > { %v1284_v39 = vmul.f32 %v1282_v42, %v1279_v30  ;;  %v1283_v40 = vmul.f32 %v1281_v9, %v1279_v30  ;;  %v1339_v3 = vrot.slane %v1336_v61, 4 }
 0x20e   : > { %v1287_v48 = vrot.slane %v1284_v39, 4  ;;  %v1340_v26 = vsel %vm811_vm8, %v1335_v4, %v1339_v3 }
 0x210   : > { %v1288_v8 = vsel %vm811_vm8, %v1283_v40, %v1287_v48 }
 0x211   : > { %v1290_v28 = vadd.f32 %v1288_v8, %v1276_v19 }
 0x212   : > { %v1359_v56 = vpop.permute.xlu2 %1358 }
 0x213   : > { %v1304_v35 = vadd.f32 %v1302_v45, %v1290_v28  ;;  %v1364_v63 = vmul.f32 %v1362_v44, %v1359_v56  ;;  %v1363_v27 = vmul.f32 %v1361_v54, %v1359_v56 }
 0x214   : > { %v1317_v41 = vpop.permute.xlu1 %1316 }
 0x215   : > { %v1322_v23 = vmul.f32 %v1320_v46, %v1317_v41  ;;  %v1321_v16 = vmul.f32 %v1319_v22, %v1317_v41  ;;  %v1367_v5 = vrot.slane %v1364_v63, 4 }
 0x217   : > { %v1325_v1 = vrot.slane %v1322_v23, 4  ;;  %v1368_v42 = vsel %vm811_vm8, %v1363_v27, %v1367_v5 }
 0x219   : > { %v1326_v17 = vsel %vm811_vm8, %v1321_v16, %v1325_v1 }
 0x21a   : > { %v1328_v21 = vadd.f32 %v1326_v17, %v1304_v35 }
 0x21c   : > { %v1342_v36 = vadd.f32 %v1340_v26, %v1328_v21 }
 0x21d   : > { %v1345_v47 = vpop.permute.xlu1 %1344 }
 0x21e   : > { %v1350_v18 = vmul.f32 %v1348_v49, %v1345_v47  ;;  %v1349_v62 = vmul.f32 %v1347_v37, %v1345_v47 }
 0x220   : > { %v1353_v25 = vrot.slane %v1350_v18, 4 }
 0x222   : > { %v1354_v34 = vsel %vm811_vm8, %v1349_v62, %v1353_v25 }
 0x223   : > { %v1356_v60 = vadd.f32 %v1354_v34, %v1342_v36 }
 0x225   : > { %v1370_v29 = vadd.f32 %v1368_v42, %v1356_v60 }
 0x227   : > { %v1371_v30 = vmax.f32 %v1370_v29, 0.0 }
 0x229   : > { %1372 = vst [vmem:[%s251_s9] sm:$0xff] %v1371_v30 }
 0x22a PF: > { %s16_s21 = sadd.s32 1, %s1575_s21  }
 0x22b   : > { %p13_p4 = scmp.ge.s32.totalorder %s16_s21, 4  }
 0x22d   :  { %15 = sbr.rel (!%p13_p4) target bundleno = 1 (0x1), region = 75 }

</bundles_post_ra>
